<compile_context>
chip_gen: v7x
topology: tpu7x:2x2x1
jax: 0.10.0
libtpu: 0.0.40
codegen_flags: <defaults>
</compile_context>

<pallas_src>
import functools

import jax
import jax.numpy as jnp
from jax import lax
from jax.experimental import pallas as pl
from jax.experimental.pallas import tpu as pltpu


# ----------------------------------------------------------------------------
# Pallas kernel: one (batch_block, time_chunk) grid step of the LSTM.
# ----------------------------------------------------------------------------
def _lstm_kernel(x_ref,      # (Tc, Bb, F)    f32 time-major input chunk
                 wih_ref,    # (F, 4Hp)       bf16 transposed, gate-padded W_ih
                 whh_ref,    # (Hp, 4Hp)      bf16 transposed, gate-padded W_hh
                 b_ref,      # (1, 4Hp)       f32 padded (b_ih + b_hh)
                 out_ref,    # (Tc, Bb, Hp)   f32 per-step hidden states
                 hN_ref,     # (Bb, Hp)       f32 carried / final hidden state
                 cN_ref,     # (Bb, Hp)       f32 carried / final cell state
                 xg_sc):     # scratch (Tc*Bb, 4Hp) f32: hoisted input gates
    Tc, Bb, F = x_ref.shape
    Hp = hN_ref.shape[1]
    t_chunk = pl.program_id(1)

    # Zero-init the carried state at the first time chunk of each batch block.
    # hN_ref / cN_ref have a constant block index along the time axis, so they
    # stay resident in VMEM across the whole "arbitrary" time-chunk sweep.
    @pl.when(t_chunk == 0)
    def _():
        hN_ref[...] = jnp.zeros_like(hN_ref)
        cN_ref[...] = jnp.zeros_like(cN_ref)

    # ---- Hoisted input projection: one big MXU matmul for the whole chunk ---
    # (Tc*Bb, F) x (F, 4Hp) -> (Tc*Bb, 4Hp), bias broadcast added once.
    x_flat = x_ref[...].reshape(Tc * Bb, F).astype(jnp.bfloat16)
    xg_sc[...] = (
        jnp.dot(x_flat, wih_ref[...], preferred_element_type=jnp.float32)
        + b_ref[...]
    )

    whh = whh_ref[...]          # hoisted weight load (bf16, stays in vregs/VMEM)
    h = hN_ref[...]             # f32 carried state
    c = cN_ref[...]

    # ---- Serial recurrence, fully unrolled (Tc is static) -------------------
    for t in range(Tc):
        gates = xg_sc[t * Bb:(t + 1) * Bb, :] + jnp.dot(
            h.astype(jnp.bfloat16), whh, preferred_element_type=jnp.float32)
        # PyTorch gate ordering: i, f, g, o — each gate block is one full
        # 128-lane tile, so slicing is lane-aligned (no intra-vreg relayout).
        i_g = jax.nn.sigmoid(gates[:, 0 * Hp:1 * Hp])
        f_g = jax.nn.sigmoid(gates[:, 1 * Hp:2 * Hp])
        g_g = jnp.tanh(gates[:, 2 * Hp:3 * Hp])
        o_g = jax.nn.sigmoid(gates[:, 3 * Hp:4 * Hp])

        c = f_g * c + i_g * g_g
        h = o_g * jnp.tanh(c)
        out_ref[t] = h          # (Bb, Hp): full lane-dense, unmasked store

    # Carry state to the next time chunk (and this is the final state after
    # the last chunk — no separate epilogue copies needed).
    hN_ref[...] = h
    cN_ref[...] = c


# ----------------------------------------------------------------------------
# Wrapper: padding, gate-block repacking, layout conversion (plain JAX glue).
# ----------------------------------------------------------------------------
def _round_up(x, m):
    return (x + m - 1) // m * m


def _pick_chunk(T, target=32):
    """Largest divisor of T that is <= target (static, shape-derived)."""
    tc = min(T, target)
    while T % tc:
        tc -= 1
    return tc


@functools.partial(jax.jit, static_argnames=("hidden_state_dim",))
def encoder_forward(x, w_ih, w_hh, b_ih, b_hh, *, hidden_state_dim):
    """x: (B, T, F) float32, batch_first like the PyTorch module."""
    B, T, F = x.shape
    H = hidden_state_dim

    Bp = _round_up(B, 8)        # sublane multiple (f32)
    Hp = _round_up(H, 128)      # lane multiple -> lane-dense stores / slices
    Bb = 8                      # one batch block = 8 sublanes
    Tc = _pick_chunk(T)         # time chunk (divisor of T)
    nb, nt = Bp // Bb, T // Tc

    # --- repack parameters: pad each gate block (i, f, g, o) from H to Hp ----
    def pad_gates(w):           # (4H, X) -> (4Hp, X), per-gate zero padding
        X = w.shape[-1]
        w4 = w.reshape(4, H, X)
        return jnp.pad(w4, ((0, 0), (0, Hp - H), (0, 0))).reshape(4 * Hp, X)

    wih_p = pad_gates(w_ih)                                       # (4Hp, F)
    whh_p = jnp.pad(pad_gates(w_hh), ((0, 0), (0, Hp - H)))       # (4Hp, Hp)
    bias_p = jnp.pad((b_ih + b_hh).reshape(4, H),
                     ((0, 0), (0, Hp - H))).reshape(1, 4 * Hp)    # (1, 4Hp)

    wih_t = jnp.transpose(wih_p).astype(jnp.bfloat16)             # (F, 4Hp)
    whh_t = jnp.transpose(whh_p).astype(jnp.bfloat16)             # (Hp, 4Hp)

    # --- time-major, batch-padded input --------------------------------------
    x_tm = jnp.pad(jnp.swapaxes(x, 0, 1),
                   ((0, 0), (0, Bp - B), (0, 0)))                 # (T, Bp, F)

    out_tm, h_n, c_n = pl.pallas_call(
        _lstm_kernel,
        grid=(nb, nt),
        out_shape=(
            jax.ShapeDtypeStruct((T, Bp, Hp), jnp.float32),
            jax.ShapeDtypeStruct((Bp, Hp), jnp.float32),
            jax.ShapeDtypeStruct((Bp, Hp), jnp.float32),
        ),
        in_specs=[
            pl.BlockSpec((Tc, Bb, F), lambda b, t: (t, b, 0)),    # x chunk
            pl.BlockSpec((F, 4 * Hp), lambda b, t: (0, 0)),       # W_ih^T
            pl.BlockSpec((Hp, 4 * Hp), lambda b, t: (0, 0)),      # W_hh^T
            pl.BlockSpec((1, 4 * Hp), lambda b, t: (0, 0)),       # bias
        ],
        out_specs=(
            pl.BlockSpec((Tc, Bb, Hp), lambda b, t: (t, b, 0)),   # outputs
            pl.BlockSpec((Bb, Hp), lambda b, t: (b, 0)),          # h_N (resident)
            pl.BlockSpec((Bb, Hp), lambda b, t: (b, 0)),          # c_N (resident)
        ),
        scratch_shapes=[
            pltpu.VMEM((Tc * Bb, 4 * Hp), jnp.float32),           # hoisted x-gates
        ],
        compiler_params=pltpu.CompilerParams(
            dimension_semantics=("parallel", "arbitrary")),
    )(x_tm, wih_t, whh_t, bias_p)

    lstm_output = jnp.swapaxes(out_tm[:, :B, :H], 0, 1)           # (B, T, H)
    final_hidden = h_n[None, :B, :H]                              # (1, B, H)
    final_cell = c_n[None, :B, :H]                                # (1, B, H)
    return lstm_output, (final_hidden, final_cell)


# ----------------------------------------------------------------------------
# Pure-JAX reference (PyTorch LSTM semantics, full f32) for verification.
# ----------------------------------------------------------------------------
def encoder_reference(x, w_ih, w_hh, b_ih, b_hh, hidden_state_dim):
    B, T, F = x.shape
    H = hidden_state_dim

    def step(carry, x_t):
        h, c = carry
        gates = x_t @ w_ih.T + h @ w_hh.T + b_ih + b_hh
        i = jax.nn.sigmoid(gates[:, 0 * H:1 * H])
        f = jax.nn.sigmoid(gates[:, 1 * H:2 * H])
        g = jnp.tanh(gates[:, 2 * H:3 * H])
        o = jax.nn.sigmoid(gates[:, 3 * H:4 * H])
        c = f * c + i * g
        h = o * jnp.tanh(c)
        return (h, c), h

    h0 = jnp.zeros((B, H), jnp.float32)
    c0 = jnp.zeros((B, H), jnp.float32)
    (h_n, c_n), ys = lax.scan(step, (h0, c0), jnp.swapaxes(x, 0, 1))
    return jnp.swapaxes(ys, 0, 1), (h_n[None], c_n[None])


if __name__ == "__main__":
    # Module config (num_recurrent_layers=1; dropout has no effect for 1 layer).
    # TODO(synk): inter-layer dropout for num_recurrent_layers > 1 not implemented.
    hidden_state_dim = 32
    num_input_features = 4
    batch = 2
    seq = 8

    key = jax.random.PRNGKey(0)
    k_x, k_wih, k_whh, k_bih, k_bhh = jax.random.split(key, 5)

    # Deterministic params, mimicking PyTorch LSTM init U(-1/sqrt(H), 1/sqrt(H)).
    bound = 1.0 / (hidden_state_dim ** 0.5)
    w_ih = jax.random.uniform(k_wih, (4 * hidden_state_dim, num_input_features),
                              jnp.float32, -bound, bound)
    w_hh = jax.random.uniform(k_whh, (4 * hidden_state_dim, hidden_state_dim),
                              jnp.float32, -bound, bound)
    b_ih = jax.random.uniform(k_bih, (4 * hidden_state_dim,), jnp.float32, -bound, bound)
    b_hh = jax.random.uniform(k_bhh, (4 * hidden_state_dim,), jnp.float32, -bound, bound)

    x = jax.random.normal(k_x, (batch, seq, num_input_features), jnp.float32)

    lstm_out, (h_n, c_n) = encoder_forward(
        x, w_ih, w_hh, b_ih, b_hh, hidden_state_dim=hidden_state_dim)
    jax.block_until_ready((lstm_out, h_n, c_n))

    # Verify against pure-JAX f32 reference with PyTorch LSTM semantics.
    # (bf16 MXU operands in the kernel -> slightly looser tolerance than f32.)
    ref_out, (ref_h, ref_c) = encoder_reference(
        x, w_ih, w_hh, b_ih, b_hh, hidden_state_dim)
    assert lstm_out.shape == (batch, seq, hidden_state_dim)
    assert h_n.shape == (1, batch, hidden_state_dim)
    assert c_n.shape == (1, batch, hidden_state_dim)
    assert jnp.allclose(lstm_out, ref_out, atol=2e-2, rtol=2e-2)
    assert jnp.allclose(h_n, ref_h, atol=2e-2, rtol=2e-2)
    assert jnp.allclose(c_n, ref_c, atol=2e-2, rtol=2e-2)

    print("KERNEL_OK")
</pallas_src>

<mosaic_0001>
module attributes {stable_mosaic.version = 11 : i64} {
  func.func @_lstm_kernel(%arg0: i32, %arg1: i32, %arg2: memref<8x8x4xf32, #tpu.memory_space<vmem>>, %arg3: memref<4x512xbf16, #tpu.memory_space<vmem>>, %arg4: memref<128x512xbf16, #tpu.memory_space<vmem>>, %arg5: memref<1x512xf32, #tpu.memory_space<vmem>>, %arg6: memref<8x8x128xf32, #tpu.memory_space<vmem>>, %arg7: memref<8x128xf32, #tpu.memory_space<vmem>>, %arg8: memref<8x128xf32, #tpu.memory_space<vmem>>, %arg9: memref<64x512xf32, #tpu.memory_space<vmem>>) attributes {dimension_semantics = [#tpu.dimension_semantics<parallel>, #tpu.dimension_semantics<arbitrary>], iteration_bounds = array<i64: 1, 1>, scalar_prefetch = 0 : i64, scratch_operands = 1 : i64, tpu.core_type = #tpu.core_type<tc>, window_params = [{transform_indices = @transform_0, window_bounds = array<i64: 8, 8, 4>}, {pipeline_mode = #tpu.pipeline_mode<synchronous>, transform_indices = @transform_1, window_bounds = array<i64: 4, 512>}, {pipeline_mode = #tpu.pipeline_mode<synchronous>, transform_indices = @transform_2, window_bounds = array<i64: 128, 512>}, {pipeline_mode = #tpu.pipeline_mode<synchronous>, transform_indices = @transform_3, window_bounds = array<i64: 1, 512>}, {transform_indices = @transform_4, window_bounds = array<i64: 8, 8, 128>}, {transform_indices = @transform_5, window_bounds = array<i64: 8, 128>}, {transform_indices = @transform_6, window_bounds = array<i64: 8, 128>}]} {
    %c0_i32 = arith.constant 0 : i32
    %0 = arith.cmpi eq, %arg1, %c0_i32 : i32
    %1 = arith.extui %0 : i1 to i32
    %c0_i32_0 = arith.constant 0 : i32
    %2 = arith.cmpi ne, %1, %c0_i32_0 : i32
    scf.if %2 {
      %cst_77 = arith.constant 0.000000e+00 : f32
      %273 = vector.broadcast %cst_77 : f32 to vector<8x128xf32>
      %c0_78 = arith.constant 0 : index
      %c0_79 = arith.constant 0 : index
      %274 = vector.load %arg7[%c0_78, %c0_79] : memref<8x128xf32, #tpu.memory_space<vmem>>, vector<8x128xf32>
      tpu.vector_store %arg7[%c0_78, %c0_79], %273 {strides = array<i32>} : memref<8x128xf32, #tpu.memory_space<vmem>>, vector<8x128xf32>,
      %cst_80 = arith.constant 0.000000e+00 : f32
      %275 = vector.broadcast %cst_80 : f32 to vector<8x128xf32>
      %c0_81 = arith.constant 0 : index
      %c0_82 = arith.constant 0 : index
      %276 = vector.load %arg8[%c0_81, %c0_82] : memref<8x128xf32, #tpu.memory_space<vmem>>, vector<8x128xf32>
      tpu.vector_store %arg8[%c0_81, %c0_82], %275 {strides = array<i32>} : memref<8x128xf32, #tpu.memory_space<vmem>>, vector<8x128xf32>,
    } else {
    }
    %c0 = arith.constant 0 : index
    %c0_1 = arith.constant 0 : index
    %c0_2 = arith.constant 0 : index
    %3 = vector.load %arg2[%c0, %c0_1, %c0_2] : memref<8x8x4xf32, #tpu.memory_space<vmem>>, vector<8x8x4xf32>
    %4 = vector.shape_cast %3 : vector<8x8x4xf32> to vector<64x4xf32>
    %5 = arith.truncf %4 : vector<64x4xf32> to vector<64x4xbf16>
    %c0_3 = arith.constant 0 : index
    %c0_4 = arith.constant 0 : index
    %6 = vector.load %arg3[%c0_3, %c0_4] : memref<4x512xbf16, #tpu.memory_space<vmem>>, vector<4x512xbf16>
    %cst = arith.constant dense<0.000000e+00> : vector<64x512xf32>
    %7 = tpu.matmul %5, %6, %cst {dimension_numbers = #tpu.dot_dimension_numbers<[1], [0], [0], [1], [0, 0, 1, 1], [], []>} : vector<64x4xbf16>, vector<4x512xbf16>, vector<64x512xf32> -> vector<64x512xf32>
    %c0_5 = arith.constant 0 : index
    %c0_6 = arith.constant 0 : index
    %8 = vector.load %arg5[%c0_5, %c0_6] : memref<1x512xf32, #tpu.memory_space<vmem>>, vector<1x512xf32>
    %9 = vector.broadcast %8 : vector<1x512xf32> to vector<64x512xf32>
    %10 = arith.addf %7, %9 : vector<64x512xf32>
    %c0_7 = arith.constant 0 : index
    %c0_8 = arith.constant 0 : index
    %11 = vector.load %arg9[%c0_7, %c0_8] : memref<64x512xf32, #tpu.memory_space<vmem>>, vector<64x512xf32>
    tpu.vector_store %arg9[%c0_7, %c0_8], %10 {strides = array<i32>} : memref<64x512xf32, #tpu.memory_space<vmem>>, vector<64x512xf32>,
    %c0_9 = arith.constant 0 : index
    %c0_10 = arith.constant 0 : index
    %12 = vector.load %arg4[%c0_9, %c0_10] : memref<128x512xbf16, #tpu.memory_space<vmem>>, vector<128x512xbf16>
    %c0_11 = arith.constant 0 : index
    %c0_12 = arith.constant 0 : index
    %13 = vector.load %arg7[%c0_11, %c0_12] : memref<8x128xf32, #tpu.memory_space<vmem>>, vector<8x128xf32>
    %c0_13 = arith.constant 0 : index
    %c0_14 = arith.constant 0 : index
    %14 = vector.load %arg8[%c0_13, %c0_14] : memref<8x128xf32, #tpu.memory_space<vmem>>, vector<8x128xf32>
    %c0_15 = arith.constant 0 : index
    %c0_16 = arith.constant 0 : index
    %15 = vector.load %arg9[%c0_15, %c0_16] : memref<64x512xf32, #tpu.memory_space<vmem>>, vector<8x512xf32>
    %16 = arith.truncf %13 : vector<8x128xf32> to vector<8x128xbf16>
    %cst_17 = arith.constant dense<0.000000e+00> : vector<8x512xf32>
    %17 = tpu.matmul %16, %12, %cst_17 {dimension_numbers = #tpu.dot_dimension_numbers<[1], [0], [0], [1], [0, 0, 1, 1], [], []>} : vector<8x128xbf16>, vector<128x512xbf16>, vector<8x512xf32> -> vector<8x512xf32>
    %18 = arith.addf %15, %17 : vector<8x512xf32>
    %19 = vector.extract_strided_slice %18 {offsets = [0, 0], sizes = [8, 128], strides = [1, 1]} : vector<8x512xf32> to vector<8x128xf32>
    %20 = arith.negf %19 : vector<8x128xf32>
    %21 = math.exp %20 : vector<8x128xf32>
    %cst_18 = arith.constant 1.000000e+00 : f32
    %22 = vector.broadcast %cst_18 : f32 to vector<8x128xf32>
    %23 = arith.addf %22, %21 : vector<8x128xf32>
    %24 = arith.divf %22, %23 : vector<8x128xf32>
    %25 = vector.extract_strided_slice %18 {offsets = [0, 128], sizes = [8, 128], strides = [1, 1]} : vector<8x512xf32> to vector<8x128xf32>
    %26 = arith.negf %25 : vector<8x128xf32>
    %27 = math.exp %26 : vector<8x128xf32>
    %cst_19 = arith.constant 1.000000e+00 : f32
    %28 = vector.broadcast %cst_19 : f32 to vector<8x128xf32>
    %29 = arith.addf %28, %27 : vector<8x128xf32>
    %30 = arith.divf %28, %29 : vector<8x128xf32>
    %31 = vector.extract_strided_slice %18 {offsets = [0, 256], sizes = [8, 128], strides = [1, 1]} : vector<8x512xf32> to vector<8x128xf32>
    %32 = math.tanh %31 : vector<8x128xf32>
    %33 = vector.extract_strided_slice %18 {offsets = [0, 384], sizes = [8, 128], strides = [1, 1]} : vector<8x512xf32> to vector<8x128xf32>
    %34 = arith.negf %33 : vector<8x128xf32>
    %35 = math.exp %34 : vector<8x128xf32>
    %cst_20 = arith.constant 1.000000e+00 : f32
    %36 = vector.broadcast %cst_20 : f32 to vector<8x128xf32>
    %37 = arith.addf %36, %35 : vector<8x128xf32>
    %38 = arith.divf %36, %37 : vector<8x128xf32>
    %39 = arith.mulf %30, %14 : vector<8x128xf32>
    %40 = arith.mulf %24, %32 : vector<8x128xf32>
    %41 = arith.addf %39, %40 : vector<8x128xf32>
    %42 = math.tanh %41 : vector<8x128xf32>
    %43 = arith.mulf %38, %42 : vector<8x128xf32>
    %c0_21 = arith.constant 0 : index
    %c0_22 = arith.constant 0 : index
    %c0_23 = arith.constant 0 : index
    %44 = vector.load %arg6[%c0_21, %c0_22, %c0_23] : memref<8x8x128xf32, #tpu.memory_space<vmem>>, vector<1x8x128xf32>
    %45 = vector.shape_cast %44 : vector<1x8x128xf32> to vector<8x128xf32>
    %46 = vector.shape_cast %43 : vector<8x128xf32> to vector<1x8x128xf32>
    tpu.vector_store %arg6[%c0_21, %c0_22, %c0_23], %46 {strides = array<i32>} : memref<8x8x128xf32, #tpu.memory_space<vmem>>, vector<1x8x128xf32>,
    %c8 = arith.constant 8 : index
    %c0_24 = arith.constant 0 : index
    %47 = vector.load %arg9[%c8, %c0_24] : memref<64x512xf32, #tpu.memory_space<vmem>>, vector<8x512xf32>
    %48 = arith.truncf %43 : vector<8x128xf32> to vector<8x128xbf16>
    %cst_25 = arith.constant dense<0.000000e+00> : vector<8x512xf32>
    %49 = tpu.matmul %48, %12, %cst_25 {dimension_numbers = #tpu.dot_dimension_numbers<[1], [0], [0], [1], [0, 0, 1, 1], [], []>} : vector<8x128xbf16>, vector<128x512xbf16>, vector<8x512xf32> -> vector<8x512xf32>
    %50 = arith.addf %47, %49 : vector<8x512xf32>
    %51 = vector.extract_strided_slice %50 {offsets = [0, 0], sizes = [8, 128], strides = [1, 1]} : vector<8x512xf32> to vector<8x128xf32>
    %52 = arith.negf %51 : vector<8x128xf32>
    %53 = math.exp %52 : vector<8x128xf32>
    %cst_26 = arith.constant 1.000000e+00 : f32
    %54 = vector.broadcast %cst_26 : f32 to vector<8x128xf32>
    %55 = arith.addf %54, %53 : vector<8x128xf32>
    %56 = arith.divf %54, %55 : vector<8x128xf32>
    %57 = vector.extract_strided_slice %50 {offsets = [0, 128], sizes = [8, 128], strides = [1, 1]} : vector<8x512xf32> to vector<8x128xf32>
    %58 = arith.negf %57 : vector<8x128xf32>
    %59 = math.exp %58 : vector<8x128xf32>
    %cst_27 = arith.constant 1.000000e+00 : f32
    %60 = vector.broadcast %cst_27 : f32 to vector<8x128xf32>
    %61 = arith.addf %60, %59 : vector<8x128xf32>
    %62 = arith.divf %60, %61 : vector<8x128xf32>
    %63 = vector.extract_strided_slice %50 {offsets = [0, 256], sizes = [8, 128], strides = [1, 1]} : vector<8x512xf32> to vector<8x128xf32>
    %64 = math.tanh %63 : vector<8x128xf32>
    %65 = vector.extract_strided_slice %50 {offsets = [0, 384], sizes = [8, 128], strides = [1, 1]} : vector<8x512xf32> to vector<8x128xf32>
    %66 = arith.negf %65 : vector<8x128xf32>
    %67 = math.exp %66 : vector<8x128xf32>
    %cst_28 = arith.constant 1.000000e+00 : f32
    %68 = vector.broadcast %cst_28 : f32 to vector<8x128xf32>
    %69 = arith.addf %68, %67 : vector<8x128xf32>
    %70 = arith.divf %68, %69 : vector<8x128xf32>
    %71 = arith.mulf %62, %41 : vector<8x128xf32>
    %72 = arith.mulf %56, %64 : vector<8x128xf32>
    %73 = arith.addf %71, %72 : vector<8x128xf32>
    %74 = math.tanh %73 : vector<8x128xf32>
    %75 = arith.mulf %70, %74 : vector<8x128xf32>
    %c1 = arith.constant 1 : index
    %c0_29 = arith.constant 0 : index
    %c0_30 = arith.constant 0 : index
    %76 = vector.load %arg6[%c1, %c0_29, %c0_30] : memref<8x8x128xf32, #tpu.memory_space<vmem>>, vector<1x8x128xf32>
    %77 = vector.shape_cast %76 : vector<1x8x128xf32> to vector<8x128xf32>
    %78 = vector.shape_cast %75 : vector<8x128xf32> to vector<1x8x128xf32>
    tpu.vector_store %arg6[%c1, %c0_29, %c0_30], %78 {strides = array<i32>} : memref<8x8x128xf32, #tpu.memory_space<vmem>>, vector<1x8x128xf32>,
    %c16 = arith.constant 16 : index
    %c0_31 = arith.constant 0 : index
    %79 = vector.load %arg9[%c16, %c0_31] : memref<64x512xf32, #tpu.memory_space<vmem>>, vector<8x512xf32>
    %80 = arith.truncf %75 : vector<8x128xf32> to vector<8x128xbf16>
    %cst_32 = arith.constant dense<0.000000e+00> : vector<8x512xf32>
    %81 = tpu.matmul %80, %12, %cst_32 {dimension_numbers = #tpu.dot_dimension_numbers<[1], [0], [0], [1], [0, 0, 1, 1], [], []>} : vector<8x128xbf16>, vector<128x512xbf16>, vector<8x512xf32> -> vector<8x512xf32>
    %82 = arith.addf %79, %81 : vector<8x512xf32>
    %83 = vector.extract_strided_slice %82 {offsets = [0, 0], sizes = [8, 128], strides = [1, 1]} : vector<8x512xf32> to vector<8x128xf32>
    %84 = arith.negf %83 : vector<8x128xf32>
    %85 = math.exp %84 : vector<8x128xf32>
    %cst_33 = arith.constant 1.000000e+00 : f32
    %86 = vector.broadcast %cst_33 : f32 to vector<8x128xf32>
    %87 = arith.addf %86, %85 : vector<8x128xf32>
    %88 = arith.divf %86, %87 : vector<8x128xf32>
    %89 = vector.extract_strided_slice %82 {offsets = [0, 128], sizes = [8, 128], strides = [1, 1]} : vector<8x512xf32> to vector<8x128xf32>
    %90 = arith.negf %89 : vector<8x128xf32>
    %91 = math.exp %90 : vector<8x128xf32>
    %cst_34 = arith.constant 1.000000e+00 : f32
    %92 = vector.broadcast %cst_34 : f32 to vector<8x128xf32>
    %93 = arith.addf %92, %91 : vector<8x128xf32>
    %94 = arith.divf %92, %93 : vector<8x128xf32>
    %95 = vector.extract_strided_slice %82 {offsets = [0, 256], sizes = [8, 128], strides = [1, 1]} : vector<8x512xf32> to vector<8x128xf32>
    %96 = math.tanh %95 : vector<8x128xf32>
    %97 = vector.extract_strided_slice %82 {offsets = [0, 384], sizes = [8, 128], strides = [1, 1]} : vector<8x512xf32> to vector<8x128xf32>
    %98 = arith.negf %97 : vector<8x128xf32>
    %99 = math.exp %98 : vector<8x128xf32>
    %cst_35 = arith.constant 1.000000e+00 : f32
    %100 = vector.broadcast %cst_35 : f32 to vector<8x128xf32>
    %101 = arith.addf %100, %99 : vector<8x128xf32>
    %102 = arith.divf %100, %101 : vector<8x128xf32>
    %103 = arith.mulf %94, %73 : vector<8x128xf32>
    %104 = arith.mulf %88, %96 : vector<8x128xf32>
    %105 = arith.addf %103, %104 : vector<8x128xf32>
    %106 = math.tanh %105 : vector<8x128xf32>
    %107 = arith.mulf %102, %106 : vector<8x128xf32>
    %c2 = arith.constant 2 : index
    %c0_36 = arith.constant 0 : index
    %c0_37 = arith.constant 0 : index
    %108 = vector.load %arg6[%c2, %c0_36, %c0_37] : memref<8x8x128xf32, #tpu.memory_space<vmem>>, vector<1x8x128xf32>
    %109 = vector.shape_cast %108 : vector<1x8x128xf32> to vector<8x128xf32>
    %110 = vector.shape_cast %107 : vector<8x128xf32> to vector<1x8x128xf32>
    tpu.vector_store %arg6[%c2, %c0_36, %c0_37], %110 {strides = array<i32>} : memref<8x8x128xf32, #tpu.memory_space<vmem>>, vector<1x8x128xf32>,
    %c24 = arith.constant 24 : index
    %c0_38 = arith.constant 0 : index
    %111 = vector.load %arg9[%c24, %c0_38] : memref<64x512xf32, #tpu.memory_space<vmem>>, vector<8x512xf32>
    %112 = arith.truncf %107 : vector<8x128xf32> to vector<8x128xbf16>
    %cst_39 = arith.constant dense<0.000000e+00> : vector<8x512xf32>
    %113 = tpu.matmul %112, %12, %cst_39 {dimension_numbers = #tpu.dot_dimension_numbers<[1], [0], [0], [1], [0, 0, 1, 1], [], []>} : vector<8x128xbf16>, vector<128x512xbf16>, vector<8x512xf32> -> vector<8x512xf32>
    %114 = arith.addf %111, %113 : vector<8x512xf32>
    %115 = vector.extract_strided_slice %114 {offsets = [0, 0], sizes = [8, 128], strides = [1, 1]} : vector<8x512xf32> to vector<8x128xf32>
    %116 = arith.negf %115 : vector<8x128xf32>
    %117 = math.exp %116 : vector<8x128xf32>
    %cst_40 = arith.constant 1.000000e+00 : f32
    %118 = vector.broadcast %cst_40 : f32 to vector<8x128xf32>
    %119 = arith.addf %118, %117 : vector<8x128xf32>
    %120 = arith.divf %118, %119 : vector<8x128xf32>
    %121 = vector.extract_strided_slice %114 {offsets = [0, 128], sizes = [8, 128], strides = [1, 1]} : vector<8x512xf32> to vector<8x128xf32>
    %122 = arith.negf %121 : vector<8x128xf32>
    %123 = math.exp %122 : vector<8x128xf32>
    %cst_41 = arith.constant 1.000000e+00 : f32
    %124 = vector.broadcast %cst_41 : f32 to vector<8x128xf32>
    %125 = arith.addf %124, %123 : vector<8x128xf32>
    %126 = arith.divf %124, %125 : vector<8x128xf32>
    %127 = vector.extract_strided_slice %114 {offsets = [0, 256], sizes = [8, 128], strides = [1, 1]} : vector<8x512xf32> to vector<8x128xf32>
    %128 = math.tanh %127 : vector<8x128xf32>
    %129 = vector.extract_strided_slice %114 {offsets = [0, 384], sizes = [8, 128], strides = [1, 1]} : vector<8x512xf32> to vector<8x128xf32>
    %130 = arith.negf %129 : vector<8x128xf32>
    %131 = math.exp %130 : vector<8x128xf32>
    %cst_42 = arith.constant 1.000000e+00 : f32
    %132 = vector.broadcast %cst_42 : f32 to vector<8x128xf32>
    %133 = arith.addf %132, %131 : vector<8x128xf32>
    %134 = arith.divf %132, %133 : vector<8x128xf32>
    %135 = arith.mulf %126, %105 : vector<8x128xf32>
    %136 = arith.mulf %120, %128 : vector<8x128xf32>
    %137 = arith.addf %135, %136 : vector<8x128xf32>
    %138 = math.tanh %137 : vector<8x128xf32>
    %139 = arith.mulf %134, %138 : vector<8x128xf32>
    %c3 = arith.constant 3 : index
    %c0_43 = arith.constant 0 : index
    %c0_44 = arith.constant 0 : index
    %140 = vector.load %arg6[%c3, %c0_43, %c0_44] : memref<8x8x128xf32, #tpu.memory_space<vmem>>, vector<1x8x128xf32>
    %141 = vector.shape_cast %140 : vector<1x8x128xf32> to vector<8x128xf32>
    %142 = vector.shape_cast %139 : vector<8x128xf32> to vector<1x8x128xf32>
    tpu.vector_store %arg6[%c3, %c0_43, %c0_44], %142 {strides = array<i32>} : memref<8x8x128xf32, #tpu.memory_space<vmem>>, vector<1x8x128xf32>,
    %c32 = arith.constant 32 : index
    %c0_45 = arith.constant 0 : index
    %143 = vector.load %arg9[%c32, %c0_45] : memref<64x512xf32, #tpu.memory_space<vmem>>, vector<8x512xf32>
    %144 = arith.truncf %139 : vector<8x128xf32> to vector<8x128xbf16>
    %cst_46 = arith.constant dense<0.000000e+00> : vector<8x512xf32>
    %145 = tpu.matmul %144, %12, %cst_46 {dimension_numbers = #tpu.dot_dimension_numbers<[1], [0], [0], [1], [0, 0, 1, 1], [], []>} : vector<8x128xbf16>, vector<128x512xbf16>, vector<8x512xf32> -> vector<8x512xf32>
    %146 = arith.addf %143, %145 : vector<8x512xf32>
    %147 = vector.extract_strided_slice %146 {offsets = [0, 0], sizes = [8, 128], strides = [1, 1]} : vector<8x512xf32> to vector<8x128xf32>
    %148 = arith.negf %147 : vector<8x128xf32>
    %149 = math.exp %148 : vector<8x128xf32>
    %cst_47 = arith.constant 1.000000e+00 : f32
    %150 = vector.broadcast %cst_47 : f32 to vector<8x128xf32>
    %151 = arith.addf %150, %149 : vector<8x128xf32>
    %152 = arith.divf %150, %151 : vector<8x128xf32>
    %153 = vector.extract_strided_slice %146 {offsets = [0, 128], sizes = [8, 128], strides = [1, 1]} : vector<8x512xf32> to vector<8x128xf32>
    %154 = arith.negf %153 : vector<8x128xf32>
    %155 = math.exp %154 : vector<8x128xf32>
    %cst_48 = arith.constant 1.000000e+00 : f32
    %156 = vector.broadcast %cst_48 : f32 to vector<8x128xf32>
    %157 = arith.addf %156, %155 : vector<8x128xf32>
    %158 = arith.divf %156, %157 : vector<8x128xf32>
    %159 = vector.extract_strided_slice %146 {offsets = [0, 256], sizes = [8, 128], strides = [1, 1]} : vector<8x512xf32> to vector<8x128xf32>
    %160 = math.tanh %159 : vector<8x128xf32>
    %161 = vector.extract_strided_slice %146 {offsets = [0, 384], sizes = [8, 128], strides = [1, 1]} : vector<8x512xf32> to vector<8x128xf32>
    %162 = arith.negf %161 : vector<8x128xf32>
    %163 = math.exp %162 : vector<8x128xf32>
    %cst_49 = arith.constant 1.000000e+00 : f32
    %164 = vector.broadcast %cst_49 : f32 to vector<8x128xf32>
    %165 = arith.addf %164, %163 : vector<8x128xf32>
    %166 = arith.divf %164, %165 : vector<8x128xf32>
    %167 = arith.mulf %158, %137 : vector<8x128xf32>
    %168 = arith.mulf %152, %160 : vector<8x128xf32>
    %169 = arith.addf %167, %168 : vector<8x128xf32>
    %170 = math.tanh %169 : vector<8x128xf32>
    %171 = arith.mulf %166, %170 : vector<8x128xf32>
    %c4 = arith.constant 4 : index
    %c0_50 = arith.constant 0 : index
    %c0_51 = arith.constant 0 : index
    %172 = vector.load %arg6[%c4, %c0_50, %c0_51] : memref<8x8x128xf32, #tpu.memory_space<vmem>>, vector<1x8x128xf32>
    %173 = vector.shape_cast %172 : vector<1x8x128xf32> to vector<8x128xf32>
    %174 = vector.shape_cast %171 : vector<8x128xf32> to vector<1x8x128xf32>
    tpu.vector_store %arg6[%c4, %c0_50, %c0_51], %174 {strides = array<i32>} : memref<8x8x128xf32, #tpu.memory_space<vmem>>, vector<1x8x128xf32>,
    %c40 = arith.constant 40 : index
    %c0_52 = arith.constant 0 : index
    %175 = vector.load %arg9[%c40, %c0_52] : memref<64x512xf32, #tpu.memory_space<vmem>>, vector<8x512xf32>
    %176 = arith.truncf %171 : vector<8x128xf32> to vector<8x128xbf16>
    %cst_53 = arith.constant dense<0.000000e+00> : vector<8x512xf32>
    %177 = tpu.matmul %176, %12, %cst_53 {dimension_numbers = #tpu.dot_dimension_numbers<[1], [0], [0], [1], [0, 0, 1, 1], [], []>} : vector<8x128xbf16>, vector<128x512xbf16>, vector<8x512xf32> -> vector<8x512xf32>
    %178 = arith.addf %175, %177 : vector<8x512xf32>
    %179 = vector.extract_strided_slice %178 {offsets = [0, 0], sizes = [8, 128], strides = [1, 1]} : vector<8x512xf32> to vector<8x128xf32>
    %180 = arith.negf %179 : vector<8x128xf32>
    %181 = math.exp %180 : vector<8x128xf32>
    %cst_54 = arith.constant 1.000000e+00 : f32
    %182 = vector.broadcast %cst_54 : f32 to vector<8x128xf32>
    %183 = arith.addf %182, %181 : vector<8x128xf32>
    %184 = arith.divf %182, %183 : vector<8x128xf32>
    %185 = vector.extract_strided_slice %178 {offsets = [0, 128], sizes = [8, 128], strides = [1, 1]} : vector<8x512xf32> to vector<8x128xf32>
    %186 = arith.negf %185 : vector<8x128xf32>
    %187 = math.exp %186 : vector<8x128xf32>
    %cst_55 = arith.constant 1.000000e+00 : f32
    %188 = vector.broadcast %cst_55 : f32 to vector<8x128xf32>
    %189 = arith.addf %188, %187 : vector<8x128xf32>
    %190 = arith.divf %188, %189 : vector<8x128xf32>
    %191 = vector.extract_strided_slice %178 {offsets = [0, 256], sizes = [8, 128], strides = [1, 1]} : vector<8x512xf32> to vector<8x128xf32>
    %192 = math.tanh %191 : vector<8x128xf32>
    %193 = vector.extract_strided_slice %178 {offsets = [0, 384], sizes = [8, 128], strides = [1, 1]} : vector<8x512xf32> to vector<8x128xf32>
    %194 = arith.negf %193 : vector<8x128xf32>
    %195 = math.exp %194 : vector<8x128xf32>
    %cst_56 = arith.constant 1.000000e+00 : f32
    %196 = vector.broadcast %cst_56 : f32 to vector<8x128xf32>
    %197 = arith.addf %196, %195 : vector<8x128xf32>
    %198 = arith.divf %196, %197 : vector<8x128xf32>
    %199 = arith.mulf %190, %169 : vector<8x128xf32>
    %200 = arith.mulf %184, %192 : vector<8x128xf32>
    %201 = arith.addf %199, %200 : vector<8x128xf32>
    %202 = math.tanh %201 : vector<8x128xf32>
    %203 = arith.mulf %198, %202 : vector<8x128xf32>
    %c5 = arith.constant 5 : index
    %c0_57 = arith.constant 0 : index
    %c0_58 = arith.constant 0 : index
    %204 = vector.load %arg6[%c5, %c0_57, %c0_58] : memref<8x8x128xf32, #tpu.memory_space<vmem>>, vector<1x8x128xf32>
    %205 = vector.shape_cast %204 : vector<1x8x128xf32> to vector<8x128xf32>
    %206 = vector.shape_cast %203 : vector<8x128xf32> to vector<1x8x128xf32>
    tpu.vector_store %arg6[%c5, %c0_57, %c0_58], %206 {strides = array<i32>} : memref<8x8x128xf32, #tpu.memory_space<vmem>>, vector<1x8x128xf32>,
    %c48 = arith.constant 48 : index
    %c0_59 = arith.constant 0 : index
    %207 = vector.load %arg9[%c48, %c0_59] : memref<64x512xf32, #tpu.memory_space<vmem>>, vector<8x512xf32>
    %208 = arith.truncf %203 : vector<8x128xf32> to vector<8x128xbf16>
    %cst_60 = arith.constant dense<0.000000e+00> : vector<8x512xf32>
    %209 = tpu.matmul %208, %12, %cst_60 {dimension_numbers = #tpu.dot_dimension_numbers<[1], [0], [0], [1], [0, 0, 1, 1], [], []>} : vector<8x128xbf16>, vector<128x512xbf16>, vector<8x512xf32> -> vector<8x512xf32>
    %210 = arith.addf %207, %209 : vector<8x512xf32>
    %211 = vector.extract_strided_slice %210 {offsets = [0, 0], sizes = [8, 128], strides = [1, 1]} : vector<8x512xf32> to vector<8x128xf32>
    %212 = arith.negf %211 : vector<8x128xf32>
    %213 = math.exp %212 : vector<8x128xf32>
    %cst_61 = arith.constant 1.000000e+00 : f32
    %214 = vector.broadcast %cst_61 : f32 to vector<8x128xf32>
    %215 = arith.addf %214, %213 : vector<8x128xf32>
    %216 = arith.divf %214, %215 : vector<8x128xf32>
    %217 = vector.extract_strided_slice %210 {offsets = [0, 128], sizes = [8, 128], strides = [1, 1]} : vector<8x512xf32> to vector<8x128xf32>
    %218 = arith.negf %217 : vector<8x128xf32>
    %219 = math.exp %218 : vector<8x128xf32>
    %cst_62 = arith.constant 1.000000e+00 : f32
    %220 = vector.broadcast %cst_62 : f32 to vector<8x128xf32>
    %221 = arith.addf %220, %219 : vector<8x128xf32>
    %222 = arith.divf %220, %221 : vector<8x128xf32>
    %223 = vector.extract_strided_slice %210 {offsets = [0, 256], sizes = [8, 128], strides = [1, 1]} : vector<8x512xf32> to vector<8x128xf32>
    %224 = math.tanh %223 : vector<8x128xf32>
    %225 = vector.extract_strided_slice %210 {offsets = [0, 384], sizes = [8, 128], strides = [1, 1]} : vector<8x512xf32> to vector<8x128xf32>
    %226 = arith.negf %225 : vector<8x128xf32>
    %227 = math.exp %226 : vector<8x128xf32>
    %cst_63 = arith.constant 1.000000e+00 : f32
    %228 = vector.broadcast %cst_63 : f32 to vector<8x128xf32>
    %229 = arith.addf %228, %227 : vector<8x128xf32>
    %230 = arith.divf %228, %229 : vector<8x128xf32>
    %231 = arith.mulf %222, %201 : vector<8x128xf32>
    %232 = arith.mulf %216, %224 : vector<8x128xf32>
    %233 = arith.addf %231, %232 : vector<8x128xf32>
    %234 = math.tanh %233 : vector<8x128xf32>
    %235 = arith.mulf %230, %234 : vector<8x128xf32>
    %c6 = arith.constant 6 : index
    %c0_64 = arith.constant 0 : index
    %c0_65 = arith.constant 0 : index
    %236 = vector.load %arg6[%c6, %c0_64, %c0_65] : memref<8x8x128xf32, #tpu.memory_space<vmem>>, vector<1x8x128xf32>
    %237 = vector.shape_cast %236 : vector<1x8x128xf32> to vector<8x128xf32>
    %238 = vector.shape_cast %235 : vector<8x128xf32> to vector<1x8x128xf32>
    tpu.vector_store %arg6[%c6, %c0_64, %c0_65], %238 {strides = array<i32>} : memref<8x8x128xf32, #tpu.memory_space<vmem>>, vector<1x8x128xf32>,
    %c56 = arith.constant 56 : index
    %c0_66 = arith.constant 0 : index
    %239 = vector.load %arg9[%c56, %c0_66] : memref<64x512xf32, #tpu.memory_space<vmem>>, vector<8x512xf32>
    %240 = arith.truncf %235 : vector<8x128xf32> to vector<8x128xbf16>
    %cst_67 = arith.constant dense<0.000000e+00> : vector<8x512xf32>
    %241 = tpu.matmul %240, %12, %cst_67 {dimension_numbers = #tpu.dot_dimension_numbers<[1], [0], [0], [1], [0, 0, 1, 1], [], []>} : vector<8x128xbf16>, vector<128x512xbf16>, vector<8x512xf32> -> vector<8x512xf32>
    %242 = arith.addf %239, %241 : vector<8x512xf32>
    %243 = vector.extract_strided_slice %242 {offsets = [0, 0], sizes = [8, 128], strides = [1, 1]} : vector<8x512xf32> to vector<8x128xf32>
    %244 = arith.negf %243 : vector<8x128xf32>
    %245 = math.exp %244 : vector<8x128xf32>
    %cst_68 = arith.constant 1.000000e+00 : f32
    %246 = vector.broadcast %cst_68 : f32 to vector<8x128xf32>
    %247 = arith.addf %246, %245 : vector<8x128xf32>
    %248 = arith.divf %246, %247 : vector<8x128xf32>
    %249 = vector.extract_strided_slice %242 {offsets = [0, 128], sizes = [8, 128], strides = [1, 1]} : vector<8x512xf32> to vector<8x128xf32>
    %250 = arith.negf %249 : vector<8x128xf32>
    %251 = math.exp %250 : vector<8x128xf32>
    %cst_69 = arith.constant 1.000000e+00 : f32
    %252 = vector.broadcast %cst_69 : f32 to vector<8x128xf32>
    %253 = arith.addf %252, %251 : vector<8x128xf32>
    %254 = arith.divf %252, %253 : vector<8x128xf32>
    %255 = vector.extract_strided_slice %242 {offsets = [0, 256], sizes = [8, 128], strides = [1, 1]} : vector<8x512xf32> to vector<8x128xf32>
    %256 = math.tanh %255 : vector<8x128xf32>
    %257 = vector.extract_strided_slice %242 {offsets = [0, 384], sizes = [8, 128], strides = [1, 1]} : vector<8x512xf32> to vector<8x128xf32>
    %258 = arith.negf %257 : vector<8x128xf32>
    %259 = math.exp %258 : vector<8x128xf32>
    %cst_70 = arith.constant 1.000000e+00 : f32
    %260 = vector.broadcast %cst_70 : f32 to vector<8x128xf32>
    %261 = arith.addf %260, %259 : vector<8x128xf32>
    %262 = arith.divf %260, %261 : vector<8x128xf32>
    %263 = arith.mulf %254, %233 : vector<8x128xf32>
    %264 = arith.mulf %248, %256 : vector<8x128xf32>
    %265 = arith.addf %263, %264 : vector<8x128xf32>
    %266 = math.tanh %265 : vector<8x128xf32>
    %267 = arith.mulf %262, %266 : vector<8x128xf32>
    %c7 = arith.constant 7 : index
    %c0_71 = arith.constant 0 : index
    %c0_72 = arith.constant 0 : index
    %268 = vector.load %arg6[%c7, %c0_71, %c0_72] : memref<8x8x128xf32, #tpu.memory_space<vmem>>, vector<1x8x128xf32>
    %269 = vector.shape_cast %268 : vector<1x8x128xf32> to vector<8x128xf32>
    %270 = vector.shape_cast %267 : vector<8x128xf32> to vector<1x8x128xf32>
    tpu.vector_store %arg6[%c7, %c0_71, %c0_72], %270 {strides = array<i32>} : memref<8x8x128xf32, #tpu.memory_space<vmem>>, vector<1x8x128xf32>,
    %c0_73 = arith.constant 0 : index
    %c0_74 = arith.constant 0 : index
    %271 = vector.load %arg7[%c0_73, %c0_74] : memref<8x128xf32, #tpu.memory_space<vmem>>, vector<8x128xf32>
    tpu.vector_store %arg7[%c0_73, %c0_74], %267 {strides = array<i32>} : memref<8x128xf32, #tpu.memory_space<vmem>>, vector<8x128xf32>,
    %c0_75 = arith.constant 0 : index
    %c0_76 = arith.constant 0 : index
    %272 = vector.load %arg8[%c0_75, %c0_76] : memref<8x128xf32, #tpu.memory_space<vmem>>, vector<8x128xf32>
    tpu.vector_store %arg8[%c0_75, %c0_76], %265 {strides = array<i32>} : memref<8x128xf32, #tpu.memory_space<vmem>>, vector<8x128xf32>,
    return
  }
  func.func @transform_0(%arg0: i32, %arg1: i32) -> (i32, i32, i32) {
    %c0_i32 = arith.constant 0 : i32
    %c0_i32_0 = arith.constant 0 : i32
    return %arg1, %arg0, %c0_i32 : i32, i32, i32
  }
  func.func @transform_1(%arg0: i32, %arg1: i32) -> (i32, i32) {
    %c0_i32 = arith.constant 0 : i32
    %c0_i32_0 = arith.constant 0 : i32
    %c0_i32_1 = arith.constant 0 : i32
    return %c0_i32, %c0_i32_0 : i32, i32
  }
  func.func @transform_2(%arg0: i32, %arg1: i32) -> (i32, i32) {
    %c0_i32 = arith.constant 0 : i32
    %c0_i32_0 = arith.constant 0 : i32
    %c0_i32_1 = arith.constant 0 : i32
    return %c0_i32, %c0_i32_0 : i32, i32
  }
  func.func @transform_3(%arg0: i32, %arg1: i32) -> (i32, i32) {
    %c0_i32 = arith.constant 0 : i32
    %c0_i32_0 = arith.constant 0 : i32
    %c0_i32_1 = arith.constant 0 : i32
    return %c0_i32, %c0_i32_0 : i32, i32
  }
  func.func @transform_4(%arg0: i32, %arg1: i32) -> (i32, i32, i32) {
    %c0_i32 = arith.constant 0 : i32
    %c0_i32_0 = arith.constant 0 : i32
    return %arg1, %arg0, %c0_i32 : i32, i32, i32
  }
  func.func @transform_5(%arg0: i32, %arg1: i32) -> (i32, i32) {
    %c0_i32 = arith.constant 0 : i32
    %c0_i32_0 = arith.constant 0 : i32
    return %arg0, %c0_i32 : i32, i32
  }
  func.func @transform_6(%arg0: i32, %arg1: i32) -> (i32, i32) {
    %c0_i32 = arith.constant 0 : i32
    %c0_i32_0 = arith.constant 0 : i32
    return %arg0, %c0_i32 : i32, i32
  }
}

</mosaic_0001>

<bundles_post_ra>
// kernel: encoder_forward.1
= control target key start
LH: loop header
LB: loop body
LE: loop exit
PB: predicated region body
PF: predicated region fallthrough
CT: control target
= control target key end

     0   :  { %v42_v0 = vlaneseq  ;;  %v1712_v2 = vmov 1983009808   ;;  %v2542_v4 = vmov 0   ;;  %vm93_vm0 = vcmask 1041408   ;;  %s2535_s1 = inlined_call_operand.vmem [shape: bf16[4,512], index: 1, kind: input, shape index: {}]   ;;  %s2536_s2 = inlined_call_operand.vmem [shape: bf16[128,512], index: 2, kind: input, shape index: {}]   ;;  %s2537_s0 = inlined_call_operand.vmem [shape: f32[8,8,4], index: 0, kind: input, shape index: {}]   ;;  %s2538_s3 = inlined_call_operand.vmem [shape: f32[1,512], index: 3, kind: input, shape index: {}]   ;;  %s2539_s4 = inlined_call_operand.vmem [shape: f32[8,8,128], index: 4, kind: output, shape index: {0}]   ;;  %s2540_s6 = inlined_call_operand.vmem [shape: f32[8,128], index: 6, kind: output, shape index: {2}]   ;;  %s2541_s5 = inlined_call_operand.vmem [shape: f32[8,128], index: 5, kind: output, shape index: {1}]  }
   0x1   :  { %v39_v1 = vld [vmem:[%s2535_s1] sm:$0xff]  ;;  %v65_v3 = vunpack.c.l.s4 %v1712_v2  ;;  %138 = vmatprep.mubr.bf16.mxu0 %v2542_v4  ;;  %211 = vmatprep.mubr.bf16.mxu1 %v2542_v4  ;;  %v28_v12 = vld [vmem:[%s2537_s0 + $0x8] sm:$0xff]  ;;  %vm80_vm1 = vcmask 31744   ;;  %v29_v26 = vld [vmem:[%s2537_s0 + $0x10] sm:$0xff]  ;;  %v1714_v59 = vmov 0.0|0.0  }
   0x2   :  { %v1755_v5 = vshrl.u32 %v42_v0, 7  ;;  %v63_v7 = vcombine.high %v39_v1, %v39_v1  ;;  %v27_v11 = vld [vmem:[%s2537_s0] sm:$0xff]  ;;  %v1772_v18 = vld [vmem:[%s2536_s2 + $0xc] ss:$16 sps:$4 sm:$0xff]   ;;  %v1782_v21 = vld [vmem:[%s2536_s2 + $0x8] ss:$16 sps:$4 sm:$0xff]  }
   0x3   :  { %v66_v6 = vunpack.c.0.s8 %v65_v3  ;;  %v1767_v13 = vld [vmem:[%s2536_s2 + $0x4] ss:$16 sps:$4 sm:$0xff]   ;;  %v35_v19 = vpack.c.bf16 %v28_v12, %v27_v11  ;;  %v1777_v20 = vld [vmem:[%s2536_s2] ss:$16 sps:$4 sm:$0xff]   ;;  %v1794_v23 = vld [vmem:[%s2536_s2 + $0x2c] ss:$16 sps:$4 sm:$0xff]  }
   0x4   :  { %v1789_v22 = vld [vmem:[%s2536_s2 + $0x24] ss:$16 sps:$4 sm:$0xff]   ;;  %v1799_v24 = vld [vmem:[%s2536_s2 + $0x20] ss:$16 sps:$4 sm:$0xff]   ;;  %v1804_v25 = vld [vmem:[%s2536_s2 + $0x28] ss:$16 sps:$4 sm:$0xff]  }
   0x5   :  { %v69_v8 = vsub.s32 %v66_v6, %v1755_v5  ;;  %v30_v27 = vld [vmem:[%s2537_s0 + $0x18] sm:$0xff]  ;;  %v1819_v28 = vld [vmem:[%s2536_s2 + $0x44] ss:$16 sps:$4 sm:$0xff]   ;;  %v1833_v31 = vld [vmem:[%s2536_s2 + $0x40] ss:$16 sps:$4 sm:$0xff]   ;;  %v52_v60 = vsub.s32 2, %v1755_v5 }
   0x6   :  { %v1826_v29 = vld [vmem:[%s2536_s2 + $0x4c] ss:$16 sps:$4 sm:$0xff]   ;;  %v36_v30 = vpack.c.bf16 %v30_v27, %v29_v26  ;;  %v1838_v32 = vld [vmem:[%s2536_s2 + $0x48] ss:$16 sps:$4 sm:$0xff]   ;;  %v1845_v33 = vld [vmem:[%s2536_s2 + $0x64] ss:$16 sps:$4 sm:$0xff]  }
   0x7   :  { %v70_v9 = vrot.slane %v39_v1, %v69_v8  ;;  %v77_v10 = vrot.slane %v63_v7, %v69_v8  ;;  %v1852_v34 = vld [vmem:[%s2536_s2 + $0x6c] ss:$16 sps:$4 sm:$0xff]   ;;  %v1857_v35 = vld [vmem:[%s2536_s2 + $0x60] ss:$16 sps:$4 sm:$0xff]   ;;  %v1864_v36 = vld [vmem:[%s2536_s2 + $0x68] ss:$16 sps:$4 sm:$0xff]  }
   0x8   :  { %v31_v37 = vld [vmem:[%s2537_s0 + $0x20] sm:$0xff]  ;;  %v32_v38 = vld [vmem:[%s2537_s0 + $0x28] sm:$0xff]  ;;  %v33_v48 = vld [vmem:[%s2537_s0 + $0x30] sm:$0xff]  ;;  %v56_v61 = vsub.s32 3, %v1755_v5  ;;  %v44_v62 = vsub.s32 0, %v1755_v5  ;;  %v48_v0 = vsub.s32 1, %v1755_v5 }
   0x9   :  { %v78_v14 = vcombine.high %v70_v9, %v70_v9  ;;  %v79_v15 = vcombine.high %v77_v10, %v77_v10  ;;  %v95_v16 = vsel %vm93_vm0, %v70_v9, 0  ;;  %v101_v17 = vsel %vm93_vm0, %v77_v10, 0  ;;  %v1879_v39 = vld [vmem:[%s2536_s2 + $0x84] ss:$16 sps:$4 sm:$0xff]   ;;  %v1884_v40 = vld [vmem:[%s2536_s2 + $0x8c] ss:$16 sps:$4 sm:$0xff]  }
   0xa   :  { %v37_v41 = vpack.c.bf16 %v32_v38, %v31_v37  ;;  %v1893_v42 = vld [vmem:[%s2536_s2 + $0x80] ss:$16 sps:$4 sm:$0xff]   ;;  %v1898_v43 = vld [vmem:[%s2536_s2 + $0x88] ss:$16 sps:$4 sm:$0xff]   ;;  %v1905_v44 = vld [vmem:[%s2536_s2 + $0xa4] ss:$16 sps:$4 sm:$0xff]  }
   0xb   :  { %1427 = vmatprep.subr.msk.bf16.mxu0 %vm93_vm0, %v78_v14  ;;  %1432 = vmatprep.subr.msk.bf16.mxu1 %vm93_vm0, %v79_v15  ;;  %v1910_v45 = vld [vmem:[%s2536_s2 + $0xac] ss:$16 sps:$4 sm:$0xff]   ;;  %v1917_v46 = vld [vmem:[%s2536_s2 + $0xa0] ss:$16 sps:$4 sm:$0xff]   ;;  %v1924_v47 = vld [vmem:[%s2536_s2 + $0xa8] ss:$16 sps:$4 sm:$0xff]  }
   0xc   :  { %107 = vmatpush1.bf16.msra.mxu0 %v95_v16  ;;  %180 = vmatpush1.bf16.msra.mxu1 %v101_v17  ;;  %v34_v49 = vld [vmem:[%s2537_s0 + $0x38] sm:$0xff]  ;;  %v1937_v50 = vld [vmem:[%s2536_s2 + $0xc4] ss:$16 sps:$4 sm:$0xff]   ;;  %v1951_v53 = vld [vmem:[%s2536_s2 + $0xc0] ss:$16 sps:$4 sm:$0xff]  }
   0xd   :  { %483 = vmatprep.subr.bf16.mxu0 %v1767_v13  ;;  %524 = vmatprep.subr.bf16.mxu1 %v1772_v18  ;;  %v1942_v51 = vld [vmem:[%s2536_s2 + $0xcc] ss:$16 sps:$4 sm:$0xff]   ;;  %v38_v52 = vpack.c.bf16 %v34_v49, %v33_v48  ;;  %v1956_v54 = vld [vmem:[%s2536_s2 + $0xc8] ss:$16 sps:$4 sm:$0xff]   ;;  %v1963_v55 = vld [vmem:[%s2536_s2 + $0xe4] ss:$16 sps:$4 sm:$0xff]  }
   0xe   :  { %v1968_v56 = vld [vmem:[%s2536_s2 + $0xec] ss:$16 sps:$4 sm:$0xff]   ;;  %v1977_v57 = vld [vmem:[%s2536_s2 + $0xe0] ss:$16 sps:$4 sm:$0xff]   ;;  %v1982_v58 = vld [vmem:[%s2536_s2 + $0xe8] ss:$16 sps:$4 sm:$0xff]  }
   0xf   :  { %1428 = vmatmul.mubr.msk.bf16.vlgmr.msra.gmra.mrb[0].mxu0 %vm80_vm1, %v35_v19  ;;  %1433 = vmatmul.mubr.msk.bf16.vlgmr.msra.gmra.mrb[0].mxu1 %vm80_vm1, %v35_v19  ;;  %v40_v63 = vld [vmem:[%s2538_s3] sm:$0xf] }
  0x10   :  { %484 = vmatpush1.bf16.msra.mxu0 %v1777_v20  ;;  %525 = vmatpush1.bf16.msra.mxu1 %v1782_v21  ;;  %v2033_v1 = vrot.slane %v40_v63, %v52_v60  ;;  %v2039_v6 = vrot.slane %v40_v63, %v56_v61  ;;  %v45_v7 = vrot.slane %v40_v63, %v44_v62 }
  0x11   :  { %485 = vmatprep.subr.bf16.mxu0 %v1789_v22  ;;  %526 = vmatprep.subr.bf16.mxu1 %v1794_v23  ;;  %v49_v10 = vrot.slane %v40_v63, %v48_v0 }
  0x12   :  { %148 = vmatprep.mubr.bf16.mxu0 %v2542_v4  ;;  %221 = vmatprep.mubr.bf16.mxu1 %v2542_v4 }
  0x14   :  { %486 = vmatpush1.bf16.msra.mxu0 %v1799_v24  ;;  %527 = vmatpush1.bf16.msra.mxu1 %v1804_v25 }
  0x15   :  { %487 = vmatprep.subr.bf16.mxu0 %v1819_v28  ;;  %528 = vmatprep.subr.bf16.mxu1 %v1826_v29 }
  0x17   :  { %1429 = vmatmul.mubr.msk.bf16.gmra.mrb[4].mxu0 %vm80_vm1, %v36_v30  ;;  %1434 = vmatmul.mubr.msk.bf16.gmra.mrb[4].mxu1 %vm80_vm1, %v36_v30 }
  0x18   :  { %488 = vmatpush1.bf16.msra.mxu0 %v1833_v31  ;;  %529 = vmatpush1.bf16.msra.mxu1 %v1838_v32 }
  0x19   :  { %489 = vmatprep.subr.bf16.mxu0 %v1845_v33  ;;  %530 = vmatprep.subr.bf16.mxu1 %v1852_v34 }
  0x1a   :  { %158 = vmatprep.mubr.bf16.mxu0 %v2542_v4  ;;  %231 = vmatprep.mubr.bf16.mxu1 %v2542_v4 }
  0x1c   :  { %490 = vmatpush1.bf16.msra.mxu0 %v1857_v35  ;;  %531 = vmatpush1.bf16.msra.mxu1 %v1864_v36 }
  0x1d   :  { %491 = vmatprep.subr.bf16.mxu0 %v1879_v39  ;;  %532 = vmatprep.subr.bf16.mxu1 %v1884_v40 }
  0x1f   :  { %1430 = vmatmul.mubr.msk.bf16.gmra.mrb[8].mxu0 %vm80_vm1, %v37_v41  ;;  %1435 = vmatmul.mubr.msk.bf16.gmra.mrb[8].mxu1 %vm80_vm1, %v37_v41 }
  0x20   :  { %492 = vmatpush1.bf16.msra.mxu0 %v1893_v42  ;;  %533 = vmatpush1.bf16.msra.mxu1 %v1898_v43 }
  0x21   :  { %493 = vmatprep.subr.bf16.mxu0 %v1905_v44  ;;  %534 = vmatprep.subr.bf16.mxu1 %v1910_v45 }
  0x22   :  { %168 = vmatprep.mubr.bf16.mxu0 %v2542_v4  ;;  %241 = vmatprep.mubr.bf16.mxu1 %v2542_v4 }
  0x24   :  { %494 = vmatpush1.bf16.msra.mxu0 %v1917_v46  ;;  %535 = vmatpush1.bf16.msra.mxu1 %v1924_v47 }
  0x25   :  { %495 = vmatprep.subr.bf16.mxu0 %v1937_v50  ;;  %536 = vmatprep.subr.bf16.mxu1 %v1942_v51 }
  0x27   :  { %1431 = vmatmul.mubr.msk.bf16.gmra.mrb[12].mxu0 %vm80_vm1, %v38_v52  ;;  %1436 = vmatmul.mubr.msk.bf16.gmra.mrb[12].mxu1 %vm80_vm1, %v38_v52 }
  0x28   :  { %496 = vmatpush1.bf16.msra.mxu0 %v1951_v53  ;;  %537 = vmatpush1.bf16.msra.mxu1 %v1956_v54 }
  0x29   :  { %497 = vmatprep.subr.bf16.mxu0 %v1963_v55  ;;  %538 = vmatprep.subr.bf16.mxu1 %v1968_v56 }
  0x2a   :  { %515 = vmatprep.mubr.bf16.mxu0 %v2542_v4  ;;  %556 = vmatprep.mubr.bf16.mxu1 %v2542_v4 }
  0x2c   :  { %498 = vmatpush1.bf16.msra.mxu0 %v1977_v57  ;;  %539 = vmatpush1.bf16.msra.mxu1 %v1982_v58 }
  0x2d   :  { %599 = vmatprep.subr.bf16.mxu0 %v1767_v13  ;;  %640 = vmatprep.subr.bf16.mxu1 %v1772_v18 }
  0x2f   :  { %516 = vmatmul.mubr.bf16.vlgmr.msra.gmra.mrb[16].mxu0 %v1714_v59  ;;  %557 = vmatmul.mubr.bf16.vlgmr.msra.gmra.mrb[16].mxu1 %v1714_v59 }
  0x30   :  { %600 = vmatpush1.bf16.msra.mxu0 %v1777_v20  ;;  %641 = vmatpush1.bf16.msra.mxu1 %v1782_v21 }
  0x31   :  { %601 = vmatprep.subr.bf16.mxu0 %v1789_v22  ;;  %642 = vmatprep.subr.bf16.mxu1 %v1794_v23 }
  0x32   :  { %631 = vmatprep.mubr.bf16.mxu0 %v2542_v4  ;;  %672 = vmatprep.mubr.bf16.mxu1 %v2542_v4 }
  0x34   :  { %602 = vmatpush1.bf16.msra.mxu0 %v1799_v24  ;;  %643 = vmatpush1.bf16.msra.mxu1 %v1804_v25 }
  0x35   :  { %603 = vmatprep.subr.bf16.mxu0 %v1819_v28  ;;  %644 = vmatprep.subr.bf16.mxu1 %v1826_v29 }
  0x38   :  { %604 = vmatpush1.bf16.msra.mxu0 %v1833_v31  ;;  %645 = vmatpush1.bf16.msra.mxu1 %v1838_v32 }
  0x39   :  { %605 = vmatprep.subr.bf16.mxu0 %v1845_v33  ;;  %646 = vmatprep.subr.bf16.mxu1 %v1852_v34 }
  0x3c   :  { %606 = vmatpush1.bf16.msra.mxu0 %v1857_v35  ;;  %647 = vmatpush1.bf16.msra.mxu1 %v1864_v36 }
  0x3d   :  { %607 = vmatprep.subr.bf16.mxu0 %v1879_v39  ;;  %648 = vmatprep.subr.bf16.mxu1 %v1884_v40 }
  0x40   :  { %608 = vmatpush1.bf16.msra.mxu0 %v1893_v42  ;;  %649 = vmatpush1.bf16.msra.mxu1 %v1898_v43 }
  0x41   :  { %609 = vmatprep.subr.bf16.mxu0 %v1905_v44  ;;  %650 = vmatprep.subr.bf16.mxu1 %v1910_v45 }
  0x44   :  { %610 = vmatpush1.bf16.msra.mxu0 %v1917_v46  ;;  %651 = vmatpush1.bf16.msra.mxu1 %v1924_v47 }
  0x45   :  { %611 = vmatprep.subr.bf16.mxu0 %v1937_v50  ;;  %652 = vmatprep.subr.bf16.mxu1 %v1942_v51 }
  0x48   :  { %612 = vmatpush1.bf16.msra.mxu0 %v1951_v53  ;;  %653 = vmatpush1.bf16.msra.mxu1 %v1956_v54 }
  0x49   :  { %613 = vmatprep.subr.bf16.mxu0 %v1963_v55  ;;  %654 = vmatprep.subr.bf16.mxu1 %v1968_v56 }
  0x4c   :  { %614 = vmatpush1.bf16.msra.mxu0 %v1977_v57  ;;  %655 = vmatpush1.bf16.msra.mxu1 %v1982_v58 }
  0x4d   :  { %716 = vmatprep.subr.bf16.mxu0 %v1767_v13  ;;  %757 = vmatprep.subr.bf16.mxu1 %v1772_v18 }
  0xe2   :  { %v2035_v2 = vpop.f32.mrb[0].mxu0  ;;  %v2037_v3 = vpop.f32.mrb[0].mxu1 }
  0xe3   :  { %v142_v8 = vpop.f32.mrb[1].mxu0  ;;  %v215_v9 = vpop.f32.mrb[1].mxu1 }
  0xe4   :  { %v144_v11 = vpop.f32.mrb[2].mxu0  ;;  %v217_v12 = vpop.f32.mrb[2].mxu1 }
  0xe5   :  { %v2041_v14 = vadd.f32 %v144_v11, %v45_v7  ;;  %v146_v15 = vpop.f32.mrb[3].mxu0  ;;  %v2044_v16 = vadd.f32 %v217_v12, %v2033_v1  ;;  %v219_v5 = vpop.f32.mrb[3].mxu1 }
  0xe6   :  { %v2046_v17 = vadd.f32 %v146_v15, %v49_v10  ;;  %v2049_v19 = vadd.f32 %v219_v5, %v2039_v6 }
  0xea   :  { %v150_v26 = vpop.f32.mrb[4].mxu0  ;;  %v223_v27 = vpop.f32.mrb[4].mxu1 }
  0xeb   :  { %v2051_v30 = vadd.f32 %v150_v26, %v45_v7  ;;  %v152_v37 = vpop.f32.mrb[5].mxu0  ;;  %v2054_v38 = vadd.f32 %v223_v27, %v2033_v1  ;;  %v225_v41 = vpop.f32.mrb[5].mxu1 }
  0xec   :  { %v2056_v48 = vadd.f32 %v152_v37, %v49_v10  ;;  %v154_v49 = vpop.f32.mrb[6].mxu0  ;;  %v2059_v52 = vadd.f32 %v225_v41, %v2039_v6  ;;  %v227_v59 = vpop.f32.mrb[6].mxu1 }
  0xed   :  { %v2061_v60 = vadd.f32 %v154_v49, %v45_v7  ;;  %v156_v61 = vpop.f32.mrb[7].mxu0  ;;  %v2064_v62 = vadd.f32 %v227_v59, %v2033_v1  ;;  %v229_v63 = vpop.f32.mrb[7].mxu1 }
  0xee   :  { %2544 = vst [vmem:[#allocation3_spill] sm:$0xff] %v2059_v52  ;;  %v2066_v0 = vadd.f32 %v156_v61, %v49_v10  ;;  %v2069_v11 = vadd.f32 %v229_v63, %v2039_v6 }
  0xef   :  { %2545 = vst [vmem:[#allocation4_spill] sm:$0xff] %v2061_v60  ;;  %2546 = vst [vmem:[#allocation5_spill] sm:$0xff] %v2064_v62 }
  0xf0   :  { %2547 = vst [vmem:[#allocation6_spill] sm:$0xff] %v2066_v0  ;;  %2548 = vst [vmem:[#allocation7_spill] sm:$0xff] %v2069_v11 }
  0xf2   :  { %v160_v12 = vpop.f32.mrb[8].mxu0  ;;  %v233_v15 = vpop.f32.mrb[8].mxu1 }
  0xf3   :  { %v2071_v5 = vadd.f32 %v160_v12, %v45_v7  ;;  %v162_v26 = vpop.f32.mrb[9].mxu0  ;;  %v2074_v27 = vadd.f32 %v233_v15, %v2033_v1  ;;  %v235_v37 = vpop.f32.mrb[9].mxu1 }
  0xf4   :  { %v2076_v41 = vadd.f32 %v162_v26, %v49_v10  ;;  %v164_v49 = vpop.f32.mrb[10].mxu0  ;;  %v2079_v59 = vadd.f32 %v235_v37, %v2039_v6  ;;  %v237_v61 = vpop.f32.mrb[10].mxu1 }
  0xf5   :  { %2549 = vst [vmem:[#allocation8_spill] sm:$0xff] %v2071_v5  ;;  %2550 = vst [vmem:[#allocation9_spill] sm:$0xff] %v2074_v27  ;;  %v2081_v4 = vadd.f32 %v164_v49, %v45_v7  ;;  %v166_v63 = vpop.f32.mrb[11].mxu0  ;;  %v2084_v11 = vadd.f32 %v237_v61, %v2033_v1  ;;  %v239_v12 = vpop.f32.mrb[11].mxu1 }
  0xf6   :  { %2551 = vst [vmem:[#allocation10_spill] sm:$0xff] %v2076_v41  ;;  %2552 = vst [vmem:[#allocation11_spill] sm:$0xff] %v2079_v59  ;;  %v2086_v5 = vadd.f32 %v166_v63, %v49_v10  ;;  %v2089_v15 = vadd.f32 %v239_v12, %v2039_v6 }
  0xf7   :  { %2553 = vst [vmem:[#allocation12_spill] sm:$0xff] %v2081_v4  ;;  %2554 = vst [vmem:[#allocation13_spill] sm:$0xff] %v2084_v11 }
  0xf8   :  { %2555 = vst [vmem:[#allocation14_spill] sm:$0xff] %v2086_v5  ;;  %2556 = vst [vmem:[#allocation15_spill] sm:$0xff] %v2089_v15 }
  0xfa   :  { %v170_v27 = vpop.f32.mrb[12].mxu0  ;;  %v243_v26 = vpop.f32.mrb[12].mxu1 }
  0xfb   :  { %v2091_v41 = vadd.f32 %v170_v27, %v45_v7  ;;  %v172_v0 = vpop.f32.mrb[13].mxu0  ;;  %v2094_v37 = vadd.f32 %v243_v26, %v2033_v1  ;;  %v245_v49 = vpop.f32.mrb[13].mxu1 }
  0xfc   :  { %v2096_v4 = vadd.f32 %v172_v0, %v49_v10  ;;  %v174_v59 = vpop.f32.mrb[14].mxu0  ;;  %v2099_v61 = vadd.f32 %v245_v49, %v2039_v6  ;;  %v247_v63 = vpop.f32.mrb[14].mxu1  ;;  %v141_v0 = vadd.f32 %v2035_v2, %v45_v7  ;;  %v143_v49 = vadd.f32 %v142_v8, %v49_v10 }
  0xfd   :  { %2557 = vst [vmem:[#allocation16_spill] sm:$0xff] %v2091_v41  ;;  %2558 = vst [vmem:[#allocation17_spill] sm:$0xff] %v2094_v37  ;;  %v2101_v5 = vadd.f32 %v174_v59, %v45_v7  ;;  %v176_v12 = vpop.f32.mrb[15].mxu0  ;;  %v2104_v15 = vadd.f32 %v247_v63, %v2033_v1  ;;  %v249_v27 = vpop.f32.mrb[15].mxu1 }
  0xfe   :  { %2559 = vst [vmem:[#allocation18_spill] sm:$0xff] %v2096_v4  ;;  %2560 = vst [vmem:[#allocation19_spill] sm:$0xff] %v2099_v61  ;;  %v2106_v41 = vadd.f32 %v176_v12, %v49_v10  ;;  %v2109_v26 = vadd.f32 %v249_v27, %v2039_v6  ;;  %v214_v4 = vadd.f32 %v2037_v3, %v2033_v1 }
  0xff   :  { %2561 = vst [vmem:[#allocation20_spill] sm:$0xff] %v2101_v5  ;;  %2562 = vst [vmem:[#allocation21_spill] sm:$0xff] %v2104_v15  ;;  %v216_v61 = vadd.f32 %v215_v9, %v2039_v6 }
 0x100   :  { %2563 = vst [vmem:[#allocation22_spill] sm:$0xff] %v2106_v41  ;;  %2564 = vst [vmem:[#allocation23_spill] sm:$0xff] %v2109_v26 }
 0x102   :  { %v517_v59 = vpop.f32.mrb[16].mxu0  ;;  %v558_v5 = vpop.f32.mrb[16].mxu1 }
 0x103   :  { %v565_v37 = vadd.f32 %v517_v59, %v141_v0  ;;  %v567_v11 = vadd.f32 %v558_v5, %v214_v4  ;;  %v519_v63 = vpop.f32.mrb[17].mxu0  ;;  %v560_v15 = vpop.f32.mrb[17].mxu1 }
 0x104   :  { %v566_v62 = vadd.f32 %v519_v63, %v143_v49  ;;  %v568_v12 = vadd.f32 %v560_v15, %v216_v61  ;;  %v521_v41 = vpop.f32.mrb[18].mxu0  ;;  %v562_v60 = vpop.f32.mrb[18].mxu1 }
 0x105   :  { %v1469_v27 = vmul.f32 -1.442695, %v565_v37  ;;  %v522_v26 = vpop.f32.mrb[19].mxu0  ;;  %v563_v52 = vpop.f32.mrb[19].mxu1 }
 0x106   :  { %v1470_v2 = vmul.f32 -1.442695, %v566_v62  ;;  %v1471_v1 = vmul.f32 -1.442695, %v568_v12  ;;  %v2565_v26 = vmov 0  }
 0x107   :  { %1552 = vpow2.f32 %v1469_v27 }
 0x108   :  { %1554 = vpow2.f32 %v1470_v2 }
 0x109   :  { %1556 = vpow2.f32 %v1471_v1 }
 0x10a   :  { %1558 = vtanh.f32 %v567_v11 }
 0x111   :  { %v1553_v3 = vpop.eup %1552 }
 0x112   :  { %v1555_v7 = vpop.eup %1554  ;;  %v572_v6 = vadd.f32 1.0, %v1553_v3 }
 0x113   :  { %v578_v8 = vadd.f32 1.0, %v1555_v7  ;;  %v1557_v4 = vpop.eup %1556 }
 0x114   :  { %1560 = vrcp.f32 %v572_v6  ;;  %v1559_v9 = vpop.eup %1558  ;;  %v585_v41 = vadd.f32 1.0, %v1557_v4 }
 0x115   :  { %1562 = vrcp.f32 %v578_v8 }
 0x116   :  { %1564 = vrcp.f32 %v585_v41 }
 0x11e   :  { %v1561_v10 = vpop.eup %1560 }
 0x11f   :  { %v1563_v5 = vpop.eup %1562  ;;  %v589_v60 = vmul.f32 %v1561_v10, %v1559_v9 }
 0x120   :  { %v588_v15 = vmul.f32 0.0, %v1563_v5  ;;  %v1565_v62 = vpop.eup %1564 }
 0x122   :  { %v2115_v52 = vadd.f32 %v589_v60, %v588_v15 }
 0x124   :  { %1566 = vtanh.f32 %v2115_v52 }
 0x12e   :  { %v1567_v37 = vpop.eup %1566 }
 0x12f   :  { %v592_v61 = vmul.f32 %v1567_v37, %v1565_v62 }
 0x131   :  { %593 = vst [vmem:[%s2539_s4] sm:$0xff] %v592_v61  ;;  %v598_v11 = vpack.c.bf16 %v592_v61, %v592_v61 }
 0x133   :  { %632 = vmatmul.mubr.bf16.vlgmr.msra.gmra.mrb[20].mxu0 %v598_v11  ;;  %673 = vmatmul.mubr.bf16.vlgmr.msra.gmra.mrb[20].mxu1 %v598_v11 }
 0x134   :  { %717 = vmatpush1.bf16.msra.mxu0 %v1777_v20  ;;  %758 = vmatpush1.bf16.msra.mxu1 %v1782_v21 }
 0x135   :  { %718 = vmatprep.subr.bf16.mxu0 %v1789_v22  ;;  %759 = vmatprep.subr.bf16.mxu1 %v1794_v23 }
 0x136   :  { %748 = vmatprep.mubr.bf16.mxu0 %v2565_v26  ;;  %789 = vmatprep.mubr.bf16.mxu1 %v2565_v26 }
 0x138   :  { %719 = vmatpush1.bf16.msra.mxu0 %v1799_v24  ;;  %760 = vmatpush1.bf16.msra.mxu1 %v1804_v25 }
 0x139   :  { %720 = vmatprep.subr.bf16.mxu0 %v1819_v28  ;;  %761 = vmatprep.subr.bf16.mxu1 %v1826_v29 }
 0x13c   :  { %721 = vmatpush1.bf16.msra.mxu0 %v1833_v31  ;;  %762 = vmatpush1.bf16.msra.mxu1 %v1838_v32 }
 0x13d   :  { %722 = vmatprep.subr.bf16.mxu0 %v1845_v33  ;;  %763 = vmatprep.subr.bf16.mxu1 %v1852_v34 }
 0x140   :  { %723 = vmatpush1.bf16.msra.mxu0 %v1857_v35  ;;  %764 = vmatpush1.bf16.msra.mxu1 %v1864_v36 }
 0x141   :  { %724 = vmatprep.subr.bf16.mxu0 %v1879_v39  ;;  %765 = vmatprep.subr.bf16.mxu1 %v1884_v40 }
 0x144   :  { %725 = vmatpush1.bf16.msra.mxu0 %v1893_v42  ;;  %766 = vmatpush1.bf16.msra.mxu1 %v1898_v43 }
 0x145   :  { %726 = vmatprep.subr.bf16.mxu0 %v1905_v44  ;;  %767 = vmatprep.subr.bf16.mxu1 %v1910_v45 }
 0x148   :  { %727 = vmatpush1.bf16.msra.mxu0 %v1917_v46  ;;  %768 = vmatpush1.bf16.msra.mxu1 %v1924_v47 }
 0x149   :  { %728 = vmatprep.subr.bf16.mxu0 %v1937_v50  ;;  %769 = vmatprep.subr.bf16.mxu1 %v1942_v51 }
 0x14c   :  { %729 = vmatpush1.bf16.msra.mxu0 %v1951_v53  ;;  %770 = vmatpush1.bf16.msra.mxu1 %v1956_v54 }
 0x14d   :  { %730 = vmatprep.subr.bf16.mxu0 %v1963_v55  ;;  %771 = vmatprep.subr.bf16.mxu1 %v1968_v56 }
 0x150   :  { %731 = vmatpush1.bf16.msra.mxu0 %v1977_v57  ;;  %772 = vmatpush1.bf16.msra.mxu1 %v1982_v58 }
 0x151   :  { %833 = vmatprep.subr.bf16.mxu0 %v1767_v13  ;;  %874 = vmatprep.subr.bf16.mxu1 %v1772_v18 }
 0x206   :  { %v633_v0 = vpop.f32.mrb[20].mxu0  ;;  %v674_v49 = vpop.f32.mrb[20].mxu1 }
 0x207   :  { %v681_v59 = vadd.f32 %v633_v0, %v2041_v14  ;;  %v683_v63 = vadd.f32 %v674_v49, %v2044_v16  ;;  %v635_v12 = vpop.f32.mrb[21].mxu0  ;;  %v676_v27 = vpop.f32.mrb[21].mxu1 }
 0x208   :  { %v682_v2 = vadd.f32 %v635_v12, %v2046_v17  ;;  %v684_v1 = vadd.f32 %v676_v27, %v2049_v19  ;;  %v637_v3 = vpop.f32.mrb[22].mxu0  ;;  %v678_v7 = vpop.f32.mrb[22].mxu1 }
 0x209   :  { %v1472_v6 = vmul.f32 -1.442695, %v681_v59  ;;  %v638_v8 = vpop.f32.mrb[23].mxu0  ;;  %v679_v4 = vpop.f32.mrb[23].mxu1 }
 0x20a   :  { %v1473_v9 = vmul.f32 -1.442695, %v682_v2  ;;  %v1474_v10 = vmul.f32 -1.442695, %v684_v1 }
 0x20b   :  { %1568 = vpow2.f32 %v1472_v6  ;;  %v2566_v6 = vld [vmem:[#allocation3_spill] sm:$0xff] }
 0x20c   :  { %1570 = vpow2.f32 %v1473_v9 }
 0x20d   :  { %1572 = vpow2.f32 %v1474_v10 }
 0x20e   :  { %1574 = vtanh.f32 %v683_v63 }
 0x215   :  { %v1569_v5 = vpop.eup %1568 }
 0x216   :  { %v1571_v60 = vpop.eup %1570  ;;  %v688_v14 = vadd.f32 1.0, %v1569_v5 }
 0x217   :  { %v694_v16 = vadd.f32 1.0, %v1571_v60  ;;  %v1573_v17 = vpop.eup %1572 }
 0x218   :  { %1576 = vrcp.f32 %v688_v14  ;;  %v1575_v41 = vpop.eup %1574  ;;  %v701_v37 = vadd.f32 1.0, %v1573_v17 }
 0x219   :  { %1578 = vrcp.f32 %v694_v16 }
 0x21a   :  { %1580 = vrcp.f32 %v701_v37 }
 0x222   :  { %v1577_v19 = vpop.eup %1576 }
 0x223   :  { %v1579_v15 = vpop.eup %1578  ;;  %v705_v62 = vmul.f32 %v1577_v19, %v1575_v41 }
 0x224   :  { %v704_v61 = vmul.f32 %v1579_v15, %v2115_v52  ;;  %v1581_v0 = vpop.eup %1580 }
 0x226   :  { %v2160_v11 = vadd.f32 %v705_v62, %v704_v61 }
 0x228   :  { %1582 = vtanh.f32 %v2160_v11 }
 0x232   :  { %v1583_v49 = vpop.eup %1582 }
 0x233   :  { %v708_v59 = vmul.f32 %v1583_v49, %v1581_v0 }
 0x235   :  { %1475 = vst [vmem:[%s2539_s4 + $0x8] sm:$0xff] %v708_v59  ;;  %v715_v63 = vpack.c.bf16 %v708_v59, %v708_v59 }
 0x237   :  { %749 = vmatmul.mubr.bf16.vlgmr.msra.gmra.mrb[24].mxu0 %v715_v63  ;;  %790 = vmatmul.mubr.bf16.vlgmr.msra.gmra.mrb[24].mxu1 %v715_v63 }
 0x238   :  { %834 = vmatpush1.bf16.msra.mxu0 %v1777_v20  ;;  %875 = vmatpush1.bf16.msra.mxu1 %v1782_v21 }
 0x239   :  { %835 = vmatprep.subr.bf16.mxu0 %v1789_v22  ;;  %876 = vmatprep.subr.bf16.mxu1 %v1794_v23 }
 0x23a   :  { %865 = vmatprep.mubr.bf16.mxu0 %v2565_v26  ;;  %906 = vmatprep.mubr.bf16.mxu1 %v2565_v26 }
 0x23c   :  { %836 = vmatpush1.bf16.msra.mxu0 %v1799_v24  ;;  %877 = vmatpush1.bf16.msra.mxu1 %v1804_v25 }
 0x23d   :  { %837 = vmatprep.subr.bf16.mxu0 %v1819_v28  ;;  %878 = vmatprep.subr.bf16.mxu1 %v1826_v29 }
 0x240   :  { %838 = vmatpush1.bf16.msra.mxu0 %v1833_v31  ;;  %879 = vmatpush1.bf16.msra.mxu1 %v1838_v32 }
 0x241   :  { %839 = vmatprep.subr.bf16.mxu0 %v1845_v33  ;;  %880 = vmatprep.subr.bf16.mxu1 %v1852_v34 }
 0x244   :  { %840 = vmatpush1.bf16.msra.mxu0 %v1857_v35  ;;  %881 = vmatpush1.bf16.msra.mxu1 %v1864_v36 }
 0x245   :  { %841 = vmatprep.subr.bf16.mxu0 %v1879_v39  ;;  %882 = vmatprep.subr.bf16.mxu1 %v1884_v40 }
 0x248   :  { %842 = vmatpush1.bf16.msra.mxu0 %v1893_v42  ;;  %883 = vmatpush1.bf16.msra.mxu1 %v1898_v43 }
 0x249   :  { %843 = vmatprep.subr.bf16.mxu0 %v1905_v44  ;;  %884 = vmatprep.subr.bf16.mxu1 %v1910_v45 }
 0x24c   :  { %844 = vmatpush1.bf16.msra.mxu0 %v1917_v46  ;;  %885 = vmatpush1.bf16.msra.mxu1 %v1924_v47 }
 0x24d   :  { %845 = vmatprep.subr.bf16.mxu0 %v1937_v50  ;;  %886 = vmatprep.subr.bf16.mxu1 %v1942_v51 }
 0x250   :  { %846 = vmatpush1.bf16.msra.mxu0 %v1951_v53  ;;  %887 = vmatpush1.bf16.msra.mxu1 %v1956_v54 }
 0x251   :  { %847 = vmatprep.subr.bf16.mxu0 %v1963_v55  ;;  %888 = vmatprep.subr.bf16.mxu1 %v1968_v56 }
 0x254   :  { %848 = vmatpush1.bf16.msra.mxu0 %v1977_v57  ;;  %889 = vmatpush1.bf16.msra.mxu1 %v1982_v58 }
 0x255   :  { %950 = vmatprep.subr.bf16.mxu0 %v1767_v13  ;;  %991 = vmatprep.subr.bf16.mxu1 %v1772_v18 }
 0x30a   :  { %v750_v52 = vpop.f32.mrb[24].mxu0  ;;  %v791_v12 = vpop.f32.mrb[24].mxu1 }
 0x30b   :  { %v798_v27 = vadd.f32 %v750_v52, %v2051_v30  ;;  %v800_v2 = vadd.f32 %v791_v12, %v2054_v38  ;;  %v752_v1 = vpop.f32.mrb[25].mxu0  ;;  %v793_v3 = vpop.f32.mrb[25].mxu1 }
 0x30c   :  { %v799_v7 = vadd.f32 %v752_v1, %v2056_v48  ;;  %v801_v8 = vadd.f32 %v793_v3, %v2566_v6  ;;  %v754_v4 = vpop.f32.mrb[26].mxu0  ;;  %v795_v9 = vpop.f32.mrb[26].mxu1  ;;  %v2568_v3 = vld [vmem:[#allocation5_spill] sm:$0xff] }
 0x30d   :  { %v1476_v10 = vmul.f32 -1.442695, %v798_v27  ;;  %v755_v5 = vpop.f32.mrb[27].mxu0  ;;  %v796_v60 = vpop.f32.mrb[27].mxu1  ;;  %v2569_v4 = vld [vmem:[#allocation6_spill] sm:$0xff] }
 0x30e   :  { %v1477_v14 = vmul.f32 -1.442695, %v799_v7  ;;  %v1478_v16 = vmul.f32 -1.442695, %v801_v8 }
 0x30f   :  { %1584 = vpow2.f32 %v1476_v10  ;;  %v2570_v10 = vld [vmem:[#allocation7_spill] sm:$0xff] }
 0x310   :  { %1586 = vpow2.f32 %v1477_v14 }
 0x311   :  { %1588 = vpow2.f32 %v1478_v16 }
 0x312   :  { %1590 = vtanh.f32 %v800_v2  ;;  %v2567_v2 = vld [vmem:[#allocation4_spill] sm:$0xff] }
 0x319   :  { %v1585_v17 = vpop.eup %1584 }
 0x31a   :  { %v1587_v41 = vpop.eup %1586  ;;  %v805_v30 = vadd.f32 1.0, %v1585_v17 }
 0x31b   :  { %v811_v38 = vadd.f32 1.0, %v1587_v41  ;;  %v1589_v48 = vpop.eup %1588 }
 0x31c   :  { %1592 = vrcp.f32 %v805_v30  ;;  %v1591_v19 = vpop.eup %1590  ;;  %v818_v61 = vadd.f32 1.0, %v1589_v48 }
 0x31d   :  { %1594 = vrcp.f32 %v811_v38 }
 0x31e   :  { %1596 = vrcp.f32 %v818_v61 }
 0x326   :  { %v1593_v15 = vpop.eup %1592 }
 0x327   :  { %v1595_v62 = vpop.eup %1594  ;;  %v822_v37 = vmul.f32 %v1593_v15, %v1591_v19 }
 0x328   :  { %v821_v0 = vmul.f32 %v1595_v62, %v2160_v11  ;;  %v1597_v59 = vpop.eup %1596 }
 0x32a   :  { %v2205_v49 = vadd.f32 %v822_v37, %v821_v0 }
 0x32c   :  { %1598 = vtanh.f32 %v2205_v49 }
 0x336   :  { %v1599_v63 = vpop.eup %1598 }
 0x337   :  { %v825_v52 = vmul.f32 %v1599_v63, %v1597_v59 }
 0x339   :  { %1479 = vst [vmem:[%s2539_s4 + $0x10] sm:$0xff] %v825_v52  ;;  %v832_v12 = vpack.c.bf16 %v825_v52, %v825_v52 }
 0x33b   :  { %866 = vmatmul.mubr.bf16.vlgmr.msra.gmra.mrb[28].mxu0 %v832_v12  ;;  %907 = vmatmul.mubr.bf16.vlgmr.msra.gmra.mrb[28].mxu1 %v832_v12 }
 0x33c   :  { %951 = vmatpush1.bf16.msra.mxu0 %v1777_v20  ;;  %992 = vmatpush1.bf16.msra.mxu1 %v1782_v21 }
 0x33d   :  { %952 = vmatprep.subr.bf16.mxu0 %v1789_v22  ;;  %993 = vmatprep.subr.bf16.mxu1 %v1794_v23 }
 0x33e   :  { %982 = vmatprep.mubr.bf16.mxu0 %v2565_v26  ;;  %1023 = vmatprep.mubr.bf16.mxu1 %v2565_v26 }
 0x340   :  { %953 = vmatpush1.bf16.msra.mxu0 %v1799_v24  ;;  %994 = vmatpush1.bf16.msra.mxu1 %v1804_v25 }
 0x341   :  { %954 = vmatprep.subr.bf16.mxu0 %v1819_v28  ;;  %995 = vmatprep.subr.bf16.mxu1 %v1826_v29 }
 0x344   :  { %955 = vmatpush1.bf16.msra.mxu0 %v1833_v31  ;;  %996 = vmatpush1.bf16.msra.mxu1 %v1838_v32 }
 0x345   :  { %956 = vmatprep.subr.bf16.mxu0 %v1845_v33  ;;  %997 = vmatprep.subr.bf16.mxu1 %v1852_v34 }
 0x348   :  { %957 = vmatpush1.bf16.msra.mxu0 %v1857_v35  ;;  %998 = vmatpush1.bf16.msra.mxu1 %v1864_v36 }
 0x349   :  { %958 = vmatprep.subr.bf16.mxu0 %v1879_v39  ;;  %999 = vmatprep.subr.bf16.mxu1 %v1884_v40 }
 0x34c   :  { %959 = vmatpush1.bf16.msra.mxu0 %v1893_v42  ;;  %1000 = vmatpush1.bf16.msra.mxu1 %v1898_v43 }
 0x34d   :  { %960 = vmatprep.subr.bf16.mxu0 %v1905_v44  ;;  %1001 = vmatprep.subr.bf16.mxu1 %v1910_v45 }
 0x350   :  { %961 = vmatpush1.bf16.msra.mxu0 %v1917_v46  ;;  %1002 = vmatpush1.bf16.msra.mxu1 %v1924_v47 }
 0x351   :  { %962 = vmatprep.subr.bf16.mxu0 %v1937_v50  ;;  %1003 = vmatprep.subr.bf16.mxu1 %v1942_v51 }
 0x354   :  { %963 = vmatpush1.bf16.msra.mxu0 %v1951_v53  ;;  %1004 = vmatpush1.bf16.msra.mxu1 %v1956_v54 }
 0x355   :  { %964 = vmatprep.subr.bf16.mxu0 %v1963_v55  ;;  %1005 = vmatprep.subr.bf16.mxu1 %v1968_v56 }
 0x358   :  { %965 = vmatpush1.bf16.msra.mxu0 %v1977_v57  ;;  %1006 = vmatpush1.bf16.msra.mxu1 %v1982_v58 }
 0x359   :  { %1067 = vmatprep.subr.bf16.mxu0 %v1767_v13  ;;  %1108 = vmatprep.subr.bf16.mxu1 %v1772_v18 }
 0x40e   :  { %v867_v11 = vpop.f32.mrb[28].mxu0  ;;  %v908_v27 = vpop.f32.mrb[28].mxu1 }
 0x40f   :  { %v915_v1 = vadd.f32 %v867_v11, %v2567_v2  ;;  %v917_v7 = vadd.f32 %v908_v27, %v2568_v3  ;;  %v869_v6 = vpop.f32.mrb[29].mxu0  ;;  %v910_v8 = vpop.f32.mrb[29].mxu1 }
 0x410   :  { %v916_v9 = vadd.f32 %v869_v6, %v2569_v4  ;;  %v918_v5 = vadd.f32 %v910_v8, %v2570_v10  ;;  %v871_v60 = vpop.f32.mrb[30].mxu0  ;;  %v912_v14 = vpop.f32.mrb[30].mxu1 }
 0x411   :  { %v1480_v16 = vmul.f32 -1.442695, %v915_v1  ;;  %v872_v17 = vpop.f32.mrb[31].mxu0  ;;  %v913_v41 = vpop.f32.mrb[31].mxu1 }
 0x412   :  { %v1481_v13 = vmul.f32 -1.442695, %v916_v9  ;;  %v1482_v18 = vmul.f32 -1.442695, %v918_v5 }
 0x413   :  { %1600 = vpow2.f32 %v1480_v16 }
 0x414   :  { %1602 = vpow2.f32 %v1481_v13  ;;  %v2314_v13 = vld [vmem:[%s2536_s2] ss:$16 sps:$4 sm:$0xff]  }
 0x415   :  { %1604 = vpow2.f32 %v1482_v18  ;;  %v2320_v18 = vld [vmem:[%s2536_s2 + $0x8] ss:$16 sps:$4 sm:$0xff]  }
 0x416   :  { %1606 = vtanh.f32 %v917_v7 }
 0x41d   :  { %v1601_v30 = vpop.eup %1600 }
 0x41e   :  { %v1603_v38 = vpop.eup %1602  ;;  %v922_v48 = vadd.f32 1.0, %v1601_v30  ;;  %v2326_v30 = vld [vmem:[%s2536_s2 + $0x24] ss:$16 sps:$4 sm:$0xff]  }
 0x41f   :  { %v928_v19 = vadd.f32 1.0, %v1603_v38  ;;  %v1605_v15 = vpop.eup %1604  ;;  %v2332_v38 = vld [vmem:[%s2536_s2 + $0x2c] ss:$16 sps:$4 sm:$0xff]  }
 0x420   :  { %1608 = vrcp.f32 %v922_v48  ;;  %v1607_v62 = vpop.eup %1606  ;;  %v935_v59 = vadd.f32 1.0, %v1605_v15  ;;  %v2340_v48 = vld [vmem:[%s2536_s2 + $0x20] ss:$16 sps:$4 sm:$0xff]   ;;  %v2352_v15 = vld [vmem:[%s2536_s2 + $0x44] ss:$16 sps:$4 sm:$0xff]  }
 0x421   :  { %1610 = vrcp.f32 %v928_v19  ;;  %v2346_v19 = vld [vmem:[%s2536_s2 + $0x28] ss:$16 sps:$4 sm:$0xff]  }
 0x422   :  { %1612 = vrcp.f32 %v935_v59  ;;  %v2382_v59 = vld [vmem:[%s2536_s2 + $0x6c] ss:$16 sps:$4 sm:$0xff]  }
 0x42a   :  { %v1609_v37 = vpop.eup %1608 }
 0x42b   :  { %v1611_v61 = vpop.eup %1610  ;;  %v939_v0 = vmul.f32 %v1609_v37, %v1607_v62  ;;  %v2358_v62 = vld [vmem:[%s2536_s2 + $0x4c] ss:$16 sps:$4 sm:$0xff]   ;;  %v2364_v37 = vld [vmem:[%s2536_s2 + $0x40] ss:$16 sps:$4 sm:$0xff]  }
 0x42c   :  { %v938_v63 = vmul.f32 %v1611_v61, %v2205_v49  ;;  %v1613_v12 = vpop.eup %1612  ;;  %v2370_v61 = vld [vmem:[%s2536_s2 + $0x48] ss:$16 sps:$4 sm:$0xff]  }
 0x42e   :  { %v2250_v52 = vadd.f32 %v939_v0, %v938_v63  ;;  %v2376_v0 = vld [vmem:[%s2536_s2 + $0x64] ss:$16 sps:$4 sm:$0xff]   ;;  %v2388_v63 = vld [vmem:[%s2536_s2 + $0x60] ss:$16 sps:$4 sm:$0xff]  }
 0x430   :  { %1614 = vtanh.f32 %v2250_v52 }
 0x43a   :  { %v1615_v11 = vpop.eup %1614 }
 0x43b   :  { %v942_v27 = vmul.f32 %v1615_v11, %v1613_v12  ;;  %v2400_v12 = vld [vmem:[%s2536_s2 + $0x84] ss:$16 sps:$4 sm:$0xff]   ;;  %v2406_v11 = vld [vmem:[%s2536_s2 + $0x8c] ss:$16 sps:$4 sm:$0xff]  }
 0x43d   :  { %1483 = vst [vmem:[%s2539_s4 + $0x18] sm:$0xff] %v942_v27  ;;  %v949_v2 = vpack.c.bf16 %v942_v27, %v942_v27  ;;  %v2412_v27 = vld [vmem:[%s2536_s2 + $0x80] ss:$16 sps:$4 sm:$0xff]  }
 0x43f   :  { %983 = vmatmul.mubr.bf16.vlgmr.msra.gmra.mrb[32].mxu0 %v949_v2  ;;  %1024 = vmatmul.mubr.bf16.vlgmr.msra.gmra.mrb[32].mxu1 %v949_v2  ;;  %v2418_v2 = vld [vmem:[%s2536_s2 + $0x88] ss:$16 sps:$4 sm:$0xff]  }
 0x440   :  { %1068 = vmatpush1.bf16.msra.mxu0 %v1777_v20  ;;  %1109 = vmatpush1.bf16.msra.mxu1 %v1782_v21  ;;  %v2291_v20 = vld [vmem:[%s2536_s2 + $0x4] ss:$16 sps:$4 sm:$0xff]   ;;  %v2297_v21 = vld [vmem:[%s2536_s2 + $0xc] ss:$16 sps:$4 sm:$0xff]  }
 0x441   :  { %1069 = vmatprep.subr.bf16.mxu0 %v1789_v22  ;;  %1110 = vmatprep.subr.bf16.mxu1 %v1794_v23 }
 0x442   :  { %1099 = vmatprep.mubr.bf16.mxu0 %v2565_v26  ;;  %1140 = vmatprep.mubr.bf16.mxu1 %v2565_v26 }
 0x444   :  { %1070 = vmatpush1.bf16.msra.mxu0 %v1799_v24  ;;  %1111 = vmatpush1.bf16.msra.mxu1 %v1804_v25  ;;  %v2571_v24 = vld [vmem:[#allocation8_spill] sm:$0xff] }
 0x445   :  { %1071 = vmatprep.subr.bf16.mxu0 %v1819_v28  ;;  %1112 = vmatprep.subr.bf16.mxu1 %v1826_v29  ;;  %v2572_v28 = vld [vmem:[#allocation9_spill] sm:$0xff] }
 0x448   :  { %1072 = vmatpush1.bf16.msra.mxu0 %v1833_v31  ;;  %1113 = vmatpush1.bf16.msra.mxu1 %v1838_v32 }
 0x449   :  { %1073 = vmatprep.subr.bf16.mxu0 %v1845_v33  ;;  %1114 = vmatprep.subr.bf16.mxu1 %v1852_v34  ;;  %v2573_v33 = vld [vmem:[#allocation10_spill] sm:$0xff] }
 0x44c   :  { %1074 = vmatpush1.bf16.msra.mxu0 %v1857_v35  ;;  %1115 = vmatpush1.bf16.msra.mxu1 %v1864_v36  ;;  %v2574_v35 = vld [vmem:[#allocation11_spill] sm:$0xff] }
 0x44d   :  { %1075 = vmatprep.subr.bf16.mxu0 %v1879_v39  ;;  %1116 = vmatprep.subr.bf16.mxu1 %v1884_v40 }
 0x450   :  { %1076 = vmatpush1.bf16.msra.mxu0 %v1893_v42  ;;  %1117 = vmatpush1.bf16.msra.mxu1 %v1898_v43 }
 0x451   :  { %1077 = vmatprep.subr.bf16.mxu0 %v1905_v44  ;;  %1118 = vmatprep.subr.bf16.mxu1 %v1910_v45 }
 0x454   :  { %1078 = vmatpush1.bf16.msra.mxu0 %v1917_v46  ;;  %1119 = vmatpush1.bf16.msra.mxu1 %v1924_v47 }
 0x455   :  { %1079 = vmatprep.subr.bf16.mxu0 %v1937_v50  ;;  %1120 = vmatprep.subr.bf16.mxu1 %v1942_v51 }
 0x458   :  { %1080 = vmatpush1.bf16.msra.mxu0 %v1951_v53  ;;  %1121 = vmatpush1.bf16.msra.mxu1 %v1956_v54 }
 0x459   :  { %1081 = vmatprep.subr.bf16.mxu0 %v1963_v55  ;;  %1122 = vmatprep.subr.bf16.mxu1 %v1968_v56 }
 0x45c   :  { %1082 = vmatpush1.bf16.msra.mxu0 %v1977_v57  ;;  %1123 = vmatpush1.bf16.msra.mxu1 %v1982_v58 }
 0x45d   :  { %1184 = vmatprep.subr.bf16.mxu0 %v2291_v20  ;;  %1225 = vmatprep.subr.bf16.mxu1 %v2297_v21 }
 0x512   :  { %v984_v22 = vpop.f32.mrb[32].mxu0  ;;  %v1025_v23 = vpop.f32.mrb[32].mxu1 }
 0x513   :  { %v1032_v25 = vadd.f32 %v984_v22, %v2571_v24  ;;  %v1034_v29 = vadd.f32 %v1025_v23, %v2572_v28  ;;  %v986_v31 = vpop.f32.mrb[33].mxu0  ;;  %v1027_v32 = vpop.f32.mrb[33].mxu1  ;;  %v2424_v22 = vld [vmem:[%s2536_s2 + $0xa4] ss:$16 sps:$4 sm:$0xff]   ;;  %v2430_v23 = vld [vmem:[%s2536_s2 + $0xac] ss:$16 sps:$4 sm:$0xff]  }
 0x514   :  { %v1033_v34 = vadd.f32 %v986_v31, %v2573_v33  ;;  %v1035_v36 = vadd.f32 %v1027_v32, %v2574_v35  ;;  %v988_v39 = vpop.f32.mrb[34].mxu0  ;;  %v1029_v40 = vpop.f32.mrb[34].mxu1  ;;  %v2436_v24 = vld [vmem:[%s2536_s2 + $0xa0] ss:$16 sps:$4 sm:$0xff]   ;;  %v2577_v33 = vld [vmem:[#allocation14_spill] sm:$0xff] }
 0x515   :  { %v1484_v42 = vmul.f32 -1.442695, %v1032_v25  ;;  %v989_v43 = vpop.f32.mrb[35].mxu0  ;;  %v1030_v44 = vpop.f32.mrb[35].mxu1  ;;  %v2442_v25 = vld [vmem:[%s2536_s2 + $0xa8] ss:$16 sps:$4 sm:$0xff]  }
 0x516   :  { %v1485_v45 = vmul.f32 -1.442695, %v1033_v34  ;;  %v1486_v46 = vmul.f32 -1.442695, %v1035_v36  ;;  %v2576_v31 = vld [vmem:[#allocation13_spill] sm:$0xff]  ;;  %v2578_v34 = vld [vmem:[#allocation15_spill] sm:$0xff] }
 0x517   :  { %1616 = vpow2.f32 %v1484_v42 }
 0x518   :  { %1618 = vpow2.f32 %v1485_v45 }
 0x519   :  { %1620 = vpow2.f32 %v1486_v46 }
 0x51a   :  { %1622 = vtanh.f32 %v1034_v29  ;;  %v2575_v29 = vld [vmem:[#allocation12_spill] sm:$0xff] }
 0x521   :  { %v1617_v47 = vpop.eup %1616 }
 0x522   :  { %v1619_v49 = vpop.eup %1618  ;;  %v1039_v1 = vadd.f32 1.0, %v1617_v47 }
 0x523   :  { %v1045_v3 = vadd.f32 1.0, %v1619_v49  ;;  %v1621_v7 = vpop.eup %1620 }
 0x524   :  { %1624 = vrcp.f32 %v1039_v1  ;;  %v1623_v6 = vpop.eup %1622  ;;  %v1052_v10 = vadd.f32 1.0, %v1621_v7 }
 0x525   :  { %1626 = vrcp.f32 %v1045_v3 }
 0x526   :  { %1628 = vrcp.f32 %v1052_v10 }
 0x52e   :  { %v1625_v8 = vpop.eup %1624 }
 0x52f   :  { %v1627_v4 = vpop.eup %1626  ;;  %v1056_v9 = vmul.f32 %v1625_v8, %v1623_v6 }
 0x530   :  { %v1055_v5 = vmul.f32 %v1627_v4, %v2250_v52  ;;  %v1629_v14 = vpop.eup %1628  ;;  %v2394_v52 = vld [vmem:[%s2536_s2 + $0x68] ss:$16 sps:$4 sm:$0xff]  }
 0x532   :  { %v2305_v60 = vadd.f32 %v1056_v9, %v1055_v5  ;;  %v1705_v5 = vld [vmem:[%s2536_s2 + $0xcc] ss:$16 sps:$4 sm:$0xff]  }
 0x534   :  { %1630 = vtanh.f32 %v2305_v60 }
 0x53e   :  { %v1631_v16 = vpop.eup %1630 }
 0x53f   :  { %v1059_v17 = vmul.f32 %v1631_v16, %v1629_v14  ;;  %v1707_v14 = vld [vmem:[%s2536_s2 + $0xc8] ss:$16 sps:$4 sm:$0xff]   ;;  %v1708_v16 = vld [vmem:[%s2536_s2 + $0xe4] ss:$16 sps:$4 sm:$0xff]  }
 0x541   :  { %1487 = vst [vmem:[%s2539_s4 + $0x20] sm:$0xff] %v1059_v17  ;;  %v1066_v41 = vpack.c.bf16 %v1059_v17, %v1059_v17  ;;  %v1709_v17 = vld [vmem:[%s2536_s2 + $0xec] ss:$16 sps:$4 sm:$0xff]  }
 0x543   :  { %1100 = vmatmul.mubr.bf16.vlgmr.msra.gmra.mrb[36].mxu0 %v1066_v41  ;;  %1141 = vmatmul.mubr.bf16.vlgmr.msra.gmra.mrb[36].mxu1 %v1066_v41  ;;  %v1710_v41 = vld [vmem:[%s2536_s2 + $0xe0] ss:$16 sps:$4 sm:$0xff]  }
 0x544   :  { %1185 = vmatpush1.bf16.msra.mxu0 %v2314_v13  ;;  %1226 = vmatpush1.bf16.msra.mxu1 %v2320_v18 }
 0x545   :  { %1186 = vmatprep.subr.bf16.mxu0 %v2326_v30  ;;  %1227 = vmatprep.subr.bf16.mxu1 %v2332_v38 }
 0x546   :  { %1216 = vmatprep.mubr.bf16.mxu0 %v2565_v26  ;;  %1257 = vmatprep.mubr.bf16.mxu1 %v2565_v26 }
 0x548   :  { %1187 = vmatpush1.bf16.msra.mxu0 %v2340_v48  ;;  %1228 = vmatpush1.bf16.msra.mxu1 %v2346_v19 }
 0x549   :  { %1188 = vmatprep.subr.bf16.mxu0 %v2352_v15  ;;  %1229 = vmatprep.subr.bf16.mxu1 %v2358_v62 }
 0x54c   :  { %1189 = vmatpush1.bf16.msra.mxu0 %v2364_v37  ;;  %1230 = vmatpush1.bf16.msra.mxu1 %v2370_v61 }
 0x54d   :  { %1190 = vmatprep.subr.bf16.mxu0 %v2376_v0  ;;  %1231 = vmatprep.subr.bf16.mxu1 %v2382_v59 }
 0x550   :  { %1191 = vmatpush1.bf16.msra.mxu0 %v2388_v63  ;;  %1232 = vmatpush1.bf16.msra.mxu1 %v2394_v52 }
 0x551   :  { %1192 = vmatprep.subr.bf16.mxu0 %v2400_v12  ;;  %1233 = vmatprep.subr.bf16.mxu1 %v2406_v11 }
 0x554   :  { %1193 = vmatpush1.bf16.msra.mxu0 %v2412_v27  ;;  %1234 = vmatpush1.bf16.msra.mxu1 %v2418_v2 }
 0x555   :  { %1194 = vmatprep.subr.bf16.mxu0 %v2424_v22  ;;  %1235 = vmatprep.subr.bf16.mxu1 %v2430_v23 }
 0x558   :  { %1195 = vmatpush1.bf16.msra.mxu0 %v2436_v24  ;;  %1236 = vmatpush1.bf16.msra.mxu1 %v2442_v25 }
 0x559   :  { %1196 = vmatprep.subr.bf16.mxu0 %v1937_v50  ;;  %1237 = vmatprep.subr.bf16.mxu1 %v1942_v51 }
 0x55c   :  { %1197 = vmatpush1.bf16.msra.mxu0 %v1951_v53  ;;  %1238 = vmatpush1.bf16.msra.mxu1 %v1956_v54 }
 0x55d   :  { %1198 = vmatprep.subr.bf16.mxu0 %v1963_v55  ;;  %1239 = vmatprep.subr.bf16.mxu1 %v1968_v56 }
 0x560   :  { %1199 = vmatpush1.bf16.msra.mxu0 %v1977_v57  ;;  %1240 = vmatpush1.bf16.msra.mxu1 %v1982_v58 }
 0x561   :  { %1301 = vmatprep.subr.bf16.mxu0 %v2291_v20  ;;  %1342 = vmatprep.subr.bf16.mxu1 %v2297_v21 }
 0x616   :  { %v1101_v28 = vpop.f32.mrb[36].mxu0  ;;  %v1142_v50 = vpop.f32.mrb[36].mxu1 }
 0x617   :  { %v1149_v51 = vadd.f32 %v1101_v28, %v2575_v29  ;;  %v1151_v53 = vadd.f32 %v1142_v50, %v2576_v31  ;;  %v1103_v32 = vpop.f32.mrb[37].mxu0  ;;  %v1144_v54 = vpop.f32.mrb[37].mxu1 }
 0x618   :  { %v1150_v55 = vadd.f32 %v1103_v32, %v2577_v33  ;;  %v1152_v56 = vadd.f32 %v1144_v54, %v2578_v34  ;;  %v1105_v35 = vpop.f32.mrb[38].mxu0  ;;  %v1146_v57 = vpop.f32.mrb[38].mxu1 }
 0x619   :  { %v1488_v36 = vmul.f32 -1.442695, %v1149_v51  ;;  %v1106_v58 = vpop.f32.mrb[39].mxu0  ;;  %v1147_v39 = vpop.f32.mrb[39].mxu1 }
 0x61a   :  { %v1489_v20 = vmul.f32 -1.442695, %v1150_v55  ;;  %v1490_v21 = vmul.f32 -1.442695, %v1152_v56  ;;  %v2583_v39 = vld [vmem:[#allocation20_spill] sm:$0xff] }
 0x61b   :  { %1632 = vpow2.f32 %v1488_v36 }
 0x61c   :  { %1634 = vpow2.f32 %v1489_v20 }
 0x61d   :  { %1636 = vpow2.f32 %v1490_v21  ;;  %v2584_v21 = vld [vmem:[#allocation21_spill] sm:$0xff] }
 0x61e   :  { %1638 = vtanh.f32 %v1151_v53 }
 0x625   :  { %v1633_v40 = vpop.eup %1632 }
 0x626   :  { %v1635_v42 = vpop.eup %1634  ;;  %v1156_v43 = vadd.f32 1.0, %v1633_v40 }
 0x627   :  { %v1162_v44 = vadd.f32 1.0, %v1635_v42  ;;  %v1637_v45 = vpop.eup %1636 }
 0x628   :  { %1640 = vrcp.f32 %v1156_v43  ;;  %v1639_v46 = vpop.eup %1638  ;;  %v1169_v3 = vadd.f32 1.0, %v1637_v45 }
 0x629   :  { %1642 = vrcp.f32 %v1162_v44  ;;  %v2585_v44 = vld [vmem:[#allocation22_spill] sm:$0xff] }
 0x62a   :  { %1644 = vrcp.f32 %v1169_v3 }
 0x632   :  { %v1641_v47 = vpop.eup %1640 }
 0x633   :  { %v1643_v49 = vpop.eup %1642  ;;  %v1173_v1 = vmul.f32 %v1641_v47, %v1639_v46  ;;  %v2586_v46 = vld [vmem:[#allocation23_spill] sm:$0xff] }
 0x634   :  { %v1172_v7 = vmul.f32 %v1643_v49, %v2305_v60  ;;  %v1645_v8 = vpop.eup %1644  ;;  %v1706_v60 = vld [vmem:[%s2536_s2 + $0xc0] ss:$16 sps:$4 sm:$0xff]  }
 0x636   :  { %v2460_v6 = vadd.f32 %v1173_v1, %v1172_v7 }
 0x638   :  { %1646 = vtanh.f32 %v2460_v6 }
 0x642   :  { %v1647_v4 = vpop.eup %1646 }
 0x643   :  { %v1176_v9 = vmul.f32 %v1647_v4, %v1645_v8 }
 0x645   :  { %1491 = vst [vmem:[%s2539_s4 + $0x28] sm:$0xff] %v1176_v9  ;;  %v1183_v10 = vpack.c.bf16 %v1176_v9, %v1176_v9 }
 0x647   :  { %1217 = vmatmul.mubr.bf16.vlgmr.msra.gmra.mrb[40].mxu0 %v1183_v10  ;;  %1258 = vmatmul.mubr.bf16.vlgmr.msra.gmra.mrb[40].mxu1 %v1183_v10 }
 0x648   :  { %1302 = vmatpush1.bf16.msra.mxu0 %v2314_v13  ;;  %1343 = vmatpush1.bf16.msra.mxu1 %v2320_v18  ;;  %v1711_v13 = vld [vmem:[%s2536_s2 + $0xe8] ss:$16 sps:$4 sm:$0xff]  }
 0x649   :  { %1303 = vmatprep.subr.bf16.mxu0 %v2326_v30  ;;  %1344 = vmatprep.subr.bf16.mxu1 %v2332_v38  ;;  %v2579_v38 = vld [vmem:[#allocation16_spill] sm:$0xff] }
 0x64a   :  { %1333 = vmatprep.mubr.bf16.mxu0 %v2565_v26  ;;  %1374 = vmatprep.mubr.bf16.mxu1 %v2565_v26  ;;  %v1704_v26 = vld [vmem:[%s2536_s2 + $0xc4] ss:$16 sps:$4 sm:$0xff]  }
 0x64c   :  { %1304 = vmatpush1.bf16.msra.mxu0 %v2340_v48  ;;  %1345 = vmatpush1.bf16.msra.mxu1 %v2346_v19  ;;  %v2580_v19 = vld [vmem:[#allocation17_spill] sm:$0xff] }
 0x64d   :  { %1305 = vmatprep.subr.bf16.mxu0 %v2352_v15  ;;  %1346 = vmatprep.subr.bf16.mxu1 %v2358_v62 }
 0x650   :  { %1306 = vmatpush1.bf16.msra.mxu0 %v2364_v37  ;;  %1347 = vmatpush1.bf16.msra.mxu1 %v2370_v61  ;;  %v2581_v61 = vld [vmem:[#allocation18_spill] sm:$0xff] }
 0x651   :  { %1307 = vmatprep.subr.bf16.mxu0 %v2376_v0  ;;  %1348 = vmatprep.subr.bf16.mxu1 %v2382_v59  ;;  %v2582_v59 = vld [vmem:[#allocation19_spill] sm:$0xff] }
 0x654   :  { %1308 = vmatpush1.bf16.msra.mxu0 %v2388_v63  ;;  %1349 = vmatpush1.bf16.msra.mxu1 %v2394_v52 }
 0x655   :  { %1309 = vmatprep.subr.bf16.mxu0 %v2400_v12  ;;  %1350 = vmatprep.subr.bf16.mxu1 %v2406_v11 }
 0x658   :  { %1310 = vmatpush1.bf16.msra.mxu0 %v2412_v27  ;;  %1351 = vmatpush1.bf16.msra.mxu1 %v2418_v2 }
 0x659   :  { %1311 = vmatprep.subr.bf16.mxu0 %v2424_v22  ;;  %1352 = vmatprep.subr.bf16.mxu1 %v2430_v23 }
 0x65c   :  { %1312 = vmatpush1.bf16.msra.mxu0 %v2436_v24  ;;  %1353 = vmatpush1.bf16.msra.mxu1 %v2442_v25 }
 0x65d   :  { %1313 = vmatprep.subr.bf16.mxu0 %v1704_v26  ;;  %1354 = vmatprep.subr.bf16.mxu1 %v1705_v5 }
 0x660   :  { %1314 = vmatpush1.bf16.msra.mxu0 %v1706_v60  ;;  %1355 = vmatpush1.bf16.msra.mxu1 %v1707_v14 }
 0x661   :  { %1315 = vmatprep.subr.bf16.mxu0 %v1708_v16  ;;  %1356 = vmatprep.subr.bf16.mxu1 %v1709_v17 }
 0x664   :  { %1316 = vmatpush1.bf16.msra.mxu0 %v1710_v41  ;;  %1357 = vmatpush1.bf16.msra.mxu1 %v1711_v13 }
 0x71a   :  { %v1218_v18 = vpop.f32.mrb[40].mxu0  ;;  %v1259_v30 = vpop.f32.mrb[40].mxu1 }
 0x71b   :  { %v1266_v48 = vadd.f32 %v1218_v18, %v2579_v38  ;;  %v1268_v15 = vadd.f32 %v1259_v30, %v2580_v19  ;;  %v1220_v62 = vpop.f32.mrb[41].mxu0  ;;  %v1261_v37 = vpop.f32.mrb[41].mxu1 }
 0x71c   :  { %v1267_v0 = vadd.f32 %v1220_v62, %v2581_v61  ;;  %v1269_v63 = vadd.f32 %v1261_v37, %v2582_v59  ;;  %v1222_v52 = vpop.f32.mrb[42].mxu0  ;;  %v1263_v12 = vpop.f32.mrb[42].mxu1 }
 0x71d   :  { %v1492_v11 = vmul.f32 -1.442695, %v1266_v48  ;;  %v1223_v27 = vpop.f32.mrb[43].mxu0  ;;  %v1264_v2 = vpop.f32.mrb[43].mxu1 }
 0x71e   :  { %v1493_v22 = vmul.f32 -1.442695, %v1267_v0  ;;  %v1494_v23 = vmul.f32 -1.442695, %v1269_v63 }
 0x71f   :  { %1648 = vpow2.f32 %v1492_v11 }
 0x720   :  { %1650 = vpow2.f32 %v1493_v22 }
 0x721   :  { %1652 = vpow2.f32 %v1494_v23 }
 0x722   :  { %1654 = vtanh.f32 %v1268_v15 }
 0x729   :  { %v1649_v24 = vpop.eup %1648 }
 0x72a   :  { %v1651_v25 = vpop.eup %1650  ;;  %v1273_v28 = vadd.f32 1.0, %v1649_v24 }
 0x72b   :  { %v1279_v50 = vadd.f32 1.0, %v1651_v25  ;;  %v1653_v29 = vpop.eup %1652 }
 0x72c   :  { %1656 = vrcp.f32 %v1273_v28  ;;  %v1655_v51 = vpop.eup %1654  ;;  %v1286_v54 = vadd.f32 1.0, %v1653_v29 }
 0x72d   :  { %1658 = vrcp.f32 %v1279_v50 }
 0x72e   :  { %1660 = vrcp.f32 %v1286_v54 }
 0x736   :  { %v1657_v31 = vpop.eup %1656 }
 0x737   :  { %v1659_v53 = vpop.eup %1658  ;;  %v1290_v32 = vmul.f32 %v1657_v31, %v1655_v51 }
 0x738   :  { %v1289_v33 = vmul.f32 %v1659_v53, %v2460_v6  ;;  %v1661_v34 = vpop.eup %1660 }
 0x73a   :  { %v1291_v55 = vadd.f32 %v1290_v32, %v1289_v33 }
 0x73c   :  { %1662 = vtanh.f32 %v1291_v55 }
 0x746   :  { %v1663_v56 = vpop.eup %1662 }
 0x747   :  { %v1293_v35 = vmul.f32 %v1663_v56, %v1661_v34 }
 0x749   :  { %1495 = vst [vmem:[%s2539_s4 + $0x30] sm:$0xff] %v1293_v35  ;;  %v1300_v57 = vpack.c.bf16 %v1293_v35, %v1293_v35 }
 0x74b   :  { %1334 = vmatmul.mubr.bf16.vlgmr.msra.gmra.mrb[44].mxu0 %v1300_v57  ;;  %1375 = vmatmul.mubr.bf16.vlgmr.msra.gmra.mrb[44].mxu1 %v1300_v57 }
 0x81e   :  { %v1335_v36 = vpop.f32.mrb[44].mxu0  ;;  %v1376_v58 = vpop.f32.mrb[44].mxu1 }
 0x81f   :  { %v1383_v20 = vadd.f32 %v1335_v36, %v2583_v39  ;;  %v1385_v40 = vadd.f32 %v1376_v58, %v2584_v21  ;;  %v1337_v42 = vpop.f32.mrb[45].mxu0  ;;  %v1378_v43 = vpop.f32.mrb[45].mxu1 }
 0x820   :  { %v1384_v45 = vadd.f32 %v1337_v42, %v2585_v44  ;;  %v1386_v47 = vadd.f32 %v1378_v43, %v2586_v46  ;;  %v1339_v49 = vpop.f32.mrb[46].mxu0  ;;  %v1380_v1 = vpop.f32.mrb[46].mxu1 }
 0x821   :  { %v1496_v3 = vmul.f32 -1.442695, %v1383_v20  ;;  %v1340_v7 = vpop.f32.mrb[47].mxu0  ;;  %v1381_v6 = vpop.f32.mrb[47].mxu1 }
 0x822   :  { %v1497_v8 = vmul.f32 -1.442695, %v1384_v45  ;;  %v1498_v4 = vmul.f32 -1.442695, %v1386_v47 }
 0x823   :  { %1664 = vpow2.f32 %v1496_v3 }
 0x824   :  { %1666 = vpow2.f32 %v1497_v8 }
 0x825   :  { %1668 = vpow2.f32 %v1498_v4 }
 0x826   :  { %1670 = vtanh.f32 %v1385_v40 }
 0x82d   :  { %v1665_v9 = vpop.eup %1664 }
 0x82e   :  { %v1667_v10 = vpop.eup %1666  ;;  %v1390_v26 = vadd.f32 1.0, %v1665_v9 }
 0x82f   :  { %v1396_v5 = vadd.f32 1.0, %v1667_v10  ;;  %v1669_v60 = vpop.eup %1668 }
 0x830   :  { %1672 = vrcp.f32 %v1390_v26  ;;  %v1671_v14 = vpop.eup %1670  ;;  %v1403_v13 = vadd.f32 1.0, %v1669_v60 }
 0x831   :  { %1674 = vrcp.f32 %v1396_v5 }
 0x832   :  { %1676 = vrcp.f32 %v1403_v13 }
 0x83a   :  { %v1673_v16 = vpop.eup %1672 }
 0x83b   :  { %v1675_v17 = vpop.eup %1674  ;;  %v1407_v41 = vmul.f32 %v1673_v16, %v1671_v14 }
 0x83c   :  { %v1406_v18 = vmul.f32 %v1675_v17, %v1291_v55  ;;  %v1677_v38 = vpop.eup %1676 }
 0x83e   :  { %v1408_v30 = vadd.f32 %v1407_v41, %v1406_v18 }
 0x840   :  { %1678 = vtanh.f32 %v1408_v30  ;;  %1414 = vst [vmem:[%s2540_s6] sm:$0xff] %v1408_v30 }
 0x84a   :  { %v1679_v48 = vpop.eup %1678 }
 0x84b   :  { %v1410_v19 = vmul.f32 %v1679_v48, %v1677_v38 }
 0x84d   :  { %1499 = vst [vmem:[%s2539_s4 + $0x38] sm:$0xff] %v1410_v19  ;;  %1413 = vst [vmem:[%s2541_s5] sm:$0xff] %v1410_v19 }

</bundles_post_ra>
